<compile_context>
chip_gen: v6e
topology: v6e:2x2x1
jax: 0.10.0
libtpu: 0.0.40
codegen_flags: <defaults>
</compile_context>

<pallas_src>
import jax
import jax.numpy as jnp
from jax.experimental import pallas as pl
from jax.experimental.pallas import tpu as pltpu


def _round_up(x, m):
    return ((x + m - 1) // m) * m


def _choose_batch_tile(batch, max_tb, in_features):
    """Pick the per-grid-step batch tile TB.

    Preferences, in order:
      * keep the double-buffered f32 activation tiles within a modest VMEM budget,
      * an even number of grid steps (v7x has 2 TensorCores; "parallel" only helps if
        both get whole steps),
      * the largest tile (amortizes the ~0.35us fixed cost per grid step),
      * a tile that exactly divides the 8-aligned batch (no wasted padded-row work).
    """
    # Cap so two (double-buffered) f32 x-tiles stay under ~16 MiB even for big images.
    # TODO(synk): for very large in_features (>~8k) add a K grid axis over D with an
    # f32 VMEM accumulator ("arbitrary" semantics) instead of shrinking the batch tile.
    budget = 16 * 1024 * 1024
    max_tb = max(8, min(max_tb, (budget // (2 * 4 * in_features)) // 8 * 8))

    bp = _round_up(batch, 8)
    units = bp // 8
    cands = [8 * k for k in range(1, units + 1) if units % k == 0 and 8 * k <= max_tb]
    best = max(cands, key=lambda tb: ((bp // tb) % 2 == 0, tb))
    if 4 * best >= min(bp, max_tb):
        return best
    # Awkward batch (e.g. 8 * large prime): use a big fixed tile and let Pallas mask the
    # ragged final block rather than degrading to tiny tiles.
    return min(max_tb, _round_up(pl.cdiv(bp, 2), 8))


def discriminator_kernel(x_ref, w1_ref, b1_ref, w2_ref, b2_ref, w3t_ref, b3_ref, o_ref):
    # Activations arrive as f32 (no wrapper-side cast/copy); quantize to bf16 on the VPU
    # in VMEM immediately before the MXU.
    x = x_ref[...].astype(jnp.bfloat16)

    # Layer 1: bf16 MXU matmul, f32 accumulation; bias + LeakyReLU stay f32
    # (v5e has no bf16 VPU/EUP).
    h1 = jnp.dot(x, w1_ref[...], preferred_element_type=jnp.float32) + b1_ref[...]
    h1 = jnp.maximum(h1, 0.2 * h1)                     # LeakyReLU(0.2): mul + max

    # Layer 2: cast only the MXU operand to bf16; keep the f32 elementwise path.
    h2 = jnp.dot(h1.astype(jnp.bfloat16), w2_ref[...],
                 preferred_element_type=jnp.float32) + b2_ref[...]
    h2 = jnp.maximum(h2, 0.2 * h2)                     # LeakyReLU(0.2)

    # Layer 3 (out_features == 1): a 1-wide matmul wastes the MXU, so use a VPU multiply
    # + XLU lane reduction instead.
    h3 = jnp.sum(h2 * w3t_ref[...], axis=-1) + b3_ref[0, 0]          # (TB,)

    # Sigmoid (exp goes to the EUP), then a lane-dense store: the per-row scalars end up
    # along lanes in the (1, 1, TB) output block, so the writeback is one dense slab
    # rather than TB lane-masked column stores.
    o_ref[0, 0, :] = 1.0 / (1.0 + jnp.exp(-h3))


def discriminator_forward(img, params, *, max_tb=1024):
    """img: (B, C, H, W) float32. Returns validity: (B, 1) float32."""
    w1, b1, w2, b2, w3, b3 = params
    B = img.shape[0]
    D = w1.shape[0]

    # == img.view(B, -1) in torch (row-major NCHW flatten). Kept in f32: the bf16 cast
    # happens inside the kernel so HBM only sees a single f32 read of the image.
    x = img.reshape(B, -1)
    assert x.shape[1] == D

    TB = _choose_batch_tile(B, max_tb, D)
    n_tiles = pl.cdiv(B, TB)        # a ragged last tile (if any) is masked by Pallas

    # Final-layer weight as a (1, 256) row so it broadcasts against (TB, 256) on the VPU.
    w3t = jnp.reshape(w3, (1, -1)).astype(jnp.float32)

    def resident(shape):
        # Whole-array block with a constant index map -> DMA'd once, resident in VMEM
        # across all grid steps. (pl.Buffered(1) / K-tiling intentionally omitted: at
        # this in_features the resident weights are ~1.3 MiB, well inside budget.)
        return pl.BlockSpec(shape, lambda i: (0, 0))

    out = pl.pallas_call(
        discriminator_kernel,
        out_shape=jax.ShapeDtypeStruct((n_tiles, 1, TB), jnp.float32),
        grid=(n_tiles,),
        in_specs=[
            pl.BlockSpec((TB, D), lambda i: (i, 0)),   # activation tile (double-buffered)
            resident(w1.shape),                        # (D, 512)   bf16, resident
            resident(b1.shape),                        # (1, 512)   f32
            resident(w2.shape),                        # (512, 256) bf16, resident
            resident(b2.shape),                        # (1, 256)   f32
            resident(w3t.shape),                       # (1, 256)   f32
            resident(b3.shape),                        # (1, 1)     f32
        ],
        out_specs=pl.BlockSpec((1, 1, TB), lambda i: (i, 0, 0)),     # lane-dense rows
        compiler_params=pltpu.CompilerParams(
            dimension_semantics=("parallel",),         # batch tiles are independent
            vmem_limit_bytes=48 * 1024 * 1024,         # headroom for TB up to 1024
        ),
    )(x, w1, b1, w2, b2, w3t, b3)

    # (n_tiles, 1, TB) in row-major order == batch order; drop any masked tail rows.
    return out.reshape(-1)[:B].reshape(B, 1)


def init_params(key, in_features):
    """Mimics nn.Linear's default U(-1/sqrt(fan_in), 1/sqrt(fan_in)).
    Weights are stored already transposed to (in, out); the two big (MXU) weights are
    stored once in bf16, the tiny final layer stays f32 (VPU path)."""
    sizes = [(in_features, 512), (512, 256), (256, 1)]
    params = []
    keys = jax.random.split(key, 2 * len(sizes))
    for i, (fan_in, fan_out) in enumerate(sizes):
        bound = 1.0 / jnp.sqrt(jnp.float32(fan_in))
        w = jax.random.uniform(keys[2 * i], (fan_in, fan_out), jnp.float32, -bound, bound)
        b = jax.random.uniform(keys[2 * i + 1], (1, fan_out), jnp.float32, -bound, bound)
        if fan_out > 1:
            w = w.astype(jnp.bfloat16)
        params += [w, b]
    return tuple(params)


def reference_forward(img, params):
    """Pure-JAX reference mirroring the kernel's mixed precision (bf16 MXU operands,
    f32 accumulation / elementwise math)."""
    w1, b1, w2, b2, w3, b3 = params
    x = img.reshape(img.shape[0], -1).astype(jnp.bfloat16).astype(jnp.float32)
    h = x @ w1.astype(jnp.float32) + b1
    h = jnp.maximum(h, 0.2 * h)
    h = h.astype(jnp.bfloat16).astype(jnp.float32) @ w2.astype(jnp.float32) + b2
    h = jnp.maximum(h, 0.2 * h)
    h3 = jnp.sum(h * jnp.reshape(w3.astype(jnp.float32), (1, -1)),
                 axis=-1, keepdims=True) + b3
    return 1.0 / (1.0 + jnp.exp(-h3))


if __name__ == "__main__":
    # Small shapes consistent with the module: batch=8, channels=4, img_size=16
    # -> in_features = 4 * 16 * 16 = 1024
    B, C, H, W = 8, 4, 16, 16
    key = jax.random.PRNGKey(0)
    k_img, k_params = jax.random.split(key)

    img = jax.random.normal(k_img, (B, C, H, W), jnp.float32)
    params = init_params(k_params, C * H * W)

    out = discriminator_forward(img, params)
    out = jax.block_until_ready(out)

    ref = reference_forward(img, params)
    assert out.shape == (B, 1)
    assert jnp.allclose(out, ref, atol=1e-3, rtol=1e-3), "mismatch vs reference"

    print("KERNEL_OK")
</pallas_src>

<mosaic_0001>
module attributes {stable_mosaic.version = 11 : i64} {
  func.func @discriminator_kernel(%arg0: i32, %arg1: memref<8x1024xf32, #tpu.memory_space<vmem>>, %arg2: memref<1024x512xbf16, #tpu.memory_space<vmem>>, %arg3: memref<1x512xf32, #tpu.memory_space<vmem>>, %arg4: memref<512x256xbf16, #tpu.memory_space<vmem>>, %arg5: memref<1x256xf32, #tpu.memory_space<vmem>>, %arg6: memref<1x256xf32, #tpu.memory_space<vmem>>, %arg7: memref<1x1xf32, #tpu.memory_space<vmem>>, %arg8: memref<1x1x8xf32, #tpu.memory_space<vmem>>) attributes {dimension_semantics = [#tpu.dimension_semantics<parallel>], iteration_bounds = array<i64: 1>, scalar_prefetch = 0 : i64, scratch_operands = 0 : i64, tpu.core_type = #tpu.core_type<tc>, window_params = [{transform_indices = @transform_0, window_bounds = array<i64: 8, 1024>}, {pipeline_mode = #tpu.pipeline_mode<synchronous>, transform_indices = @transform_1, window_bounds = array<i64: 1024, 512>}, {pipeline_mode = #tpu.pipeline_mode<synchronous>, transform_indices = @transform_2, window_bounds = array<i64: 1, 512>}, {pipeline_mode = #tpu.pipeline_mode<synchronous>, transform_indices = @transform_3, window_bounds = array<i64: 512, 256>}, {pipeline_mode = #tpu.pipeline_mode<synchronous>, transform_indices = @transform_4, window_bounds = array<i64: 1, 256>}, {pipeline_mode = #tpu.pipeline_mode<synchronous>, transform_indices = @transform_5, window_bounds = array<i64: 1, 256>}, {pipeline_mode = #tpu.pipeline_mode<synchronous>, transform_indices = @transform_6, window_bounds = array<i64: 1, 1>}, {transform_indices = @transform_7, window_bounds = array<i64: 1, 1, 8>}]} {
    %c0 = arith.constant 0 : index
    %c0_0 = arith.constant 0 : index
    %0 = vector.load %arg1[%c0, %c0_0] : memref<8x1024xf32, #tpu.memory_space<vmem>>, vector<8x1024xf32>
    %1 = arith.truncf %0 : vector<8x1024xf32> to vector<8x1024xbf16>
    %c0_1 = arith.constant 0 : index
    %c0_2 = arith.constant 0 : index
    %2 = vector.load %arg2[%c0_1, %c0_2] : memref<1024x512xbf16, #tpu.memory_space<vmem>>, vector<1024x512xbf16>
    %cst = arith.constant dense<0.000000e+00> : vector<8x512xf32>
    %3 = tpu.matmul %1, %2, %cst {dimension_numbers = #tpu.dot_dimension_numbers<[1], [0], [0], [1], [0, 0, 1, 1], [], []>} : vector<8x1024xbf16>, vector<1024x512xbf16>, vector<8x512xf32> -> vector<8x512xf32>
    %c0_3 = arith.constant 0 : index
    %c0_4 = arith.constant 0 : index
    %4 = vector.load %arg3[%c0_3, %c0_4] : memref<1x512xf32, #tpu.memory_space<vmem>>, vector<1x512xf32>
    %5 = vector.broadcast %4 : vector<1x512xf32> to vector<8x512xf32>
    %6 = arith.addf %3, %5 : vector<8x512xf32>
    %cst_5 = arith.constant 2.000000e-01 : f32
    %7 = vector.broadcast %cst_5 : f32 to vector<8x512xf32>
    %8 = arith.mulf %7, %6 : vector<8x512xf32>
    %9 = arith.maximumf %6, %8 : vector<8x512xf32>
    %10 = arith.truncf %9 : vector<8x512xf32> to vector<8x512xbf16>
    %c0_6 = arith.constant 0 : index
    %c0_7 = arith.constant 0 : index
    %11 = vector.load %arg4[%c0_6, %c0_7] : memref<512x256xbf16, #tpu.memory_space<vmem>>, vector<512x256xbf16>
    %cst_8 = arith.constant dense<0.000000e+00> : vector<8x256xf32>
    %12 = tpu.matmul %10, %11, %cst_8 {dimension_numbers = #tpu.dot_dimension_numbers<[1], [0], [0], [1], [0, 0, 1, 1], [], []>} : vector<8x512xbf16>, vector<512x256xbf16>, vector<8x256xf32> -> vector<8x256xf32>
    %c0_9 = arith.constant 0 : index
    %c0_10 = arith.constant 0 : index
    %13 = vector.load %arg5[%c0_9, %c0_10] : memref<1x256xf32, #tpu.memory_space<vmem>>, vector<1x256xf32>
    %14 = vector.broadcast %13 : vector<1x256xf32> to vector<8x256xf32>
    %15 = arith.addf %12, %14 : vector<8x256xf32>
    %cst_11 = arith.constant 2.000000e-01 : f32
    %16 = vector.broadcast %cst_11 : f32 to vector<8x256xf32>
    %17 = arith.mulf %16, %15 : vector<8x256xf32>
    %18 = arith.maximumf %15, %17 : vector<8x256xf32>
    %c0_12 = arith.constant 0 : index
    %c0_13 = arith.constant 0 : index
    %19 = vector.load %arg6[%c0_12, %c0_13] : memref<1x256xf32, #tpu.memory_space<vmem>>, vector<1x256xf32>
    %20 = vector.broadcast %19 : vector<1x256xf32> to vector<8x256xf32>
    %21 = arith.mulf %18, %20 : vector<8x256xf32>
    %cst_14 = arith.constant dense<0.000000e+00> : vector<8xf32>
    %22 = vector.multi_reduction <add>, %21, %cst_14 [1] : vector<8x256xf32> to vector<8xf32>
    %c0_15 = arith.constant 0 : index
    %c0_16 = arith.constant 0 : index
    %23 = vector.load %arg7[%c0_15, %c0_16] : memref<1x1xf32, #tpu.memory_space<vmem>>, vector<1x1xf32>
    %24 = vector.extract %23[0, 0] : f32 from vector<1x1xf32>
    %25 = vector.broadcast %24 : f32 to vector<8xf32>
    %26 = arith.addf %22, %25 : vector<8xf32>
    %cst_17 = arith.constant 0.000000e+00 : f32
    %27 = vector.broadcast %cst_17 : f32 to vector<8xf32>
    %28 = arith.subf %27, %26 : vector<8xf32>
    %29 = math.exp %28 : vector<8xf32>
    %cst_18 = arith.constant 1.000000e+00 : f32
    %30 = vector.broadcast %cst_18 : f32 to vector<8xf32>
    %31 = arith.addf %30, %29 : vector<8xf32>
    %cst_19 = arith.constant 1.000000e+00 : f32
    %32 = vector.broadcast %cst_19 : f32 to vector<8xf32>
    %33 = arith.divf %32, %31 : vector<8xf32>
    %c0_20 = arith.constant 0 : index
    %c0_21 = arith.constant 0 : index
    %c0_22 = arith.constant 0 : index
    %34 = vector.load %arg8[%c0_20, %c0_21, %c0_22] : memref<1x1x8xf32, #tpu.memory_space<vmem>>, vector<1x1x8xf32>
    %35 = vector.shape_cast %34 : vector<1x1x8xf32> to vector<8xf32>
    %36 = vector.shape_cast %33 : vector<8xf32> to vector<1x1x8xf32>
    tpu.vector_store %arg8[%c0_20, %c0_21, %c0_22], %36 {strides = array<i32>} : memref<1x1x8xf32, #tpu.memory_space<vmem>>, vector<1x1x8xf32>,
    return
  }
  func.func @transform_0(%arg0: i32) -> (i32, i32) {
    %c0_i32 = arith.constant 0 : i32
    %c0_i32_0 = arith.constant 0 : i32
    return %arg0, %c0_i32 : i32, i32
  }
  func.func @transform_1(%arg0: i32) -> (i32, i32) {
    %c0_i32 = arith.constant 0 : i32
    %c0_i32_0 = arith.constant 0 : i32
    %c0_i32_1 = arith.constant 0 : i32
    return %c0_i32, %c0_i32_0 : i32, i32
  }
  func.func @transform_2(%arg0: i32) -> (i32, i32) {
    %c0_i32 = arith.constant 0 : i32
    %c0_i32_0 = arith.constant 0 : i32
    %c0_i32_1 = arith.constant 0 : i32
    return %c0_i32, %c0_i32_0 : i32, i32
  }
  func.func @transform_3(%arg0: i32) -> (i32, i32) {
    %c0_i32 = arith.constant 0 : i32
    %c0_i32_0 = arith.constant 0 : i32
    %c0_i32_1 = arith.constant 0 : i32
    return %c0_i32, %c0_i32_0 : i32, i32
  }
  func.func @transform_4(%arg0: i32) -> (i32, i32) {
    %c0_i32 = arith.constant 0 : i32
    %c0_i32_0 = arith.constant 0 : i32
    %c0_i32_1 = arith.constant 0 : i32
    return %c0_i32, %c0_i32_0 : i32, i32
  }
  func.func @transform_5(%arg0: i32) -> (i32, i32) {
    %c0_i32 = arith.constant 0 : i32
    %c0_i32_0 = arith.constant 0 : i32
    %c0_i32_1 = arith.constant 0 : i32
    return %c0_i32, %c0_i32_0 : i32, i32
  }
  func.func @transform_6(%arg0: i32) -> (i32, i32) {
    %c0_i32 = arith.constant 0 : i32
    %c0_i32_0 = arith.constant 0 : i32
    %c0_i32_1 = arith.constant 0 : i32
    return %c0_i32, %c0_i32_0 : i32, i32
  }
  func.func @transform_7(%arg0: i32) -> (i32, i32, i32) {
    %c0_i32 = arith.constant 0 : i32
    %c0_i32_0 = arith.constant 0 : i32
    %c0_i32_1 = arith.constant 0 : i32
    return %arg0, %c0_i32, %c0_i32_0 : i32, i32, i32
  }
}

</mosaic_0001>

<bundles_post_ra>
// kernel: tpu_custom_call.1
= control target key start
LH: loop header
LB: loop body
LE: loop exit
PB: predicated region body
PF: predicated region fallthrough
CT: control target
= control target key end

     0   :  { %s3558_s0 = inlined_call_operand.hbm [shape: f32[8,1024], index: 0, kind: input, shape index: {}]   ;;  %s3559_s1 = inlined_call_operand.hbm [shape: bf16[1024,512], index: 1, kind: input, shape index: {}]   ;;  %s3560_s2 = inlined_call_operand.vmem [shape: f32[1,512], index: 2, kind: input, shape index: {}]   ;;  %s3561_s3 = inlined_call_operand.hbm [shape: bf16[512,256], index: 3, kind: input, shape index: {}]   ;;  %s3562_s4 = inlined_call_operand.vmem [shape: f32[1,256], index: 4, kind: input, shape index: {}]   ;;  %s3563_s5 = inlined_call_operand.vmem [shape: f32[1,256], index: 5, kind: input, shape index: {}]   ;;  %s3564_s6 = inlined_call_operand.<no memory space> [shape: f32[1,1], index: 6, kind: input, shape index: {}]   ;;  %s3565_s7 = inlined_call_operand.hbm [shape: f32[1,1,8], index: 7, kind: output, shape index: {}]  }
   0x1   :  { %v12_v0 = vstv %s3564_s6 }
   0x2   :  { %13 = vst [vmem:[#allocation2] sm:$0x1] %v12_v0 }
   0x3   :  { %14 = vsyncpa [#allocation4], 0 }
   0x4   :  { %15 = vsyncpa [#allocation7], 0 }
   0x5   :  { %16 = vsyncpa [#allocation5], 0  ;;  %s3417_s26 = smov [#allocation6]  }
   0x6   :  { %s32_s27 = sshll.u32 %s3417_s26, 4  ;;  %s33_s27 = int_to_ptr.vmem [resolvable:$true] %s32_s27 }
   0x7   :  { %s3339_s28 = scalar_lea.vmem %s33_s27, 32768  ;;  %p3344_p1 = scmp.lt.s32.totalorder %s33_s27, %s33_s27 }
   0x8   :  { %p3340_p0 = scmp.ne.s32.totalorder %s33_s27, %s3339_s28  ;;  %p3345_p2 = scmp.lt.s32.totalorder %s3339_s28, %s3339_s28 }
   0xa   :  { %p3346_p3 = por %p3345_p2, %p3344_p1 }
   0xc   :  { %p3347_p4 = pnand %p3346_p3, %p3340_p0 }
   0xe   :  { %3350 = shalt.err (!%p3347_p4)
}
   0xf   :  { %s3418_s29 = smov 256   ;;  %s3419_s30 = smov 16  }
  0x10   :  { %38 = dma.hbm_to_vmem [thread:$0]  %s3559_s1, 32768, %s33_s27, [#allocation7], %s3418_s29, %s3418_s29, %s3419_s30  }
  0x11   :  { %s3420_s6 = smov [#allocation3]   ;;  %s3421_s11 = smov [#allocation8]  }
  0x12   :  { %s23_s10 = sshll.u32 %s3420_s6, 4  ;;  %s46_s12 = sshll.u32 %s3421_s11, 4  ;;  %s24_s10 = int_to_ptr.vmem [resolvable:$true] %s23_s10  ;;  %s47_s12 = int_to_ptr.vmem [resolvable:$true] %s46_s12 }
  0x13   :  { %s3359_s13 = scalar_lea.vmem %s24_s10, 1024  ;;  %p3364_p6 = scmp.lt.s32.totalorder %s24_s10, %s24_s10 }
  0x14   :  { %p3360_p5 = scmp.ne.s32.totalorder %s24_s10, %s3359_s13  ;;  %p3365_p7 = scmp.lt.s32.totalorder %s3359_s13, %s3359_s13 }
  0x16   :  { %p3366_p8 = por %p3365_p7, %p3364_p6 }
  0x18   :  { %p3367_p9 = pnand %p3366_p8, %p3360_p5 }
  0x1a   :  { %3370 = shalt.err (!%p3367_p9)
}
  0x1b   :  { %26 = dma.hbm_to_vmem [thread:$0]  %s3558_s0, 1024, %s24_s10, [#allocation4]  }
  0x1c   :  { %s3379_s16 = scalar_lea.vmem %s47_s12, 8192  ;;  %p3384_p11 = scmp.lt.s32.totalorder %s47_s12, %s47_s12 }
  0x1d   :  { %p3380_p10 = scmp.ne.s32.totalorder %s47_s12, %s3379_s16  ;;  %p3385_p12 = scmp.lt.s32.totalorder %s3379_s16, %s3379_s16 }
  0x1f   :  { %p3386_p13 = por %p3385_p12, %p3384_p11 }
  0x21   :  { %p3387_p0 = pnand %p3386_p13, %p3380_p10 }
  0x23   :  { %3390 = shalt.err (!%p3387_p0)
}
  0x24   :  { %s3422_s1 = smov 128   ;;  %s3423_s17 = smov 8  }
  0x25   :  { %52 = dma.hbm_to_vmem [thread:$0]  %s3561_s3, 8192, %s47_s12, [#allocation7], %s3422_s1, %s3422_s1, %s3423_s17  }
  0x26   :  { %3411 = dma.done.wait [#allocation4], 1024  }
  0x27   :  { %3412 = vsyncadd [#allocation4], 4294966272 }
  0x28   :  { %3413 = dma.done.wait [#allocation7], 40960  }
  0x29   :  { %3414 = vsyncadd [#allocation7], 4294926336  ;;  %v2847_v1 = vld [vmem:[#allocation6 + $0xe4] ss:$16 sps:$4 sm:$0xff]   ;;  %v2851_v3 = vld [vmem:[#allocation6 + $0xe0] ss:$16 sps:$4 sm:$0xff]  }
  0x2a   :  { %v2849_v2 = vld [vmem:[#allocation6 + $0x2e4] ss:$16 sps:$4 sm:$0xff]   ;;  %1642 = vmatprep.subr.bf16.mxu0 %v2847_v1  ;;  %v2852_v4 = vld [vmem:[#allocation6 + $0x2e0] ss:$16 sps:$4 sm:$0xff]   ;;  %v69_v47 = vld [vmem:[#allocation3 + $0x8] sm:$0xff]  ;;  %vm2499_vm0 = vcmask 57344  }
  0x2b   :  { %1683 = vmatprep.subr.bf16.mxu1 %v2849_v2  ;;  %v2853_v5 = vld [vmem:[#allocation6 + $0xc4] ss:$16 sps:$4 sm:$0xff]   ;;  %1643 = vmatpush1.bf16.msra.mxu0 %v2851_v3  ;;  %v2857_v7 = vld [vmem:[#allocation6 + $0xc0] ss:$16 sps:$4 sm:$0xff]   ;;  %v3477_v50 = vpack.c.bf16 %v69_v47, %v69_v47  ;;  %v71_v51 = vld [vmem:[#allocation3 + $0x18] sm:$0xff] }
  0x2c   :  { %1684 = vmatpush1.bf16.msra.mxu1 %v2852_v4  ;;  %v2855_v6 = vld [vmem:[#allocation6 + $0x2c4] ss:$16 sps:$4 sm:$0xff]   ;;  %1644 = vmatprep.subr.bf16.mxu0 %v2853_v5  ;;  %v2858_v8 = vld [vmem:[#allocation6 + $0x2c0] ss:$16 sps:$4 sm:$0xff]   ;;  %v3479_v53 = vpack.c.bf16 %v71_v51, %v71_v51 }
  0x2d   :  { %1685 = vmatprep.subr.bf16.mxu1 %v2855_v6  ;;  %v2859_v9 = vld [vmem:[#allocation6 + $0xa4] ss:$16 sps:$4 sm:$0xff]   ;;  %v2863_v11 = vld [vmem:[#allocation6 + $0xa0] ss:$16 sps:$4 sm:$0xff]   ;;  %1674 = vmatprep.mubr.bf16.mxu0 %v3477_v50 }
  0x2e   :  { %v2861_v10 = vld [vmem:[#allocation6 + $0x2a4] ss:$16 sps:$4 sm:$0xff]   ;;  %v2864_v12 = vld [vmem:[#allocation6 + $0x2a0] ss:$16 sps:$4 sm:$0xff]   ;;  %1715 = vmatprep.mubr.bf16.mxu1 %v3479_v53 }
  0x2f   :  { %1645 = vmatpush1.bf16.msra.mxu0 %v2857_v7  ;;  %v2865_v13 = vld [vmem:[#allocation6 + $0x84] ss:$16 sps:$4 sm:$0xff]   ;;  %v2869_v15 = vld [vmem:[#allocation6 + $0x80] ss:$16 sps:$4 sm:$0xff]  }
  0x30   :  { %1686 = vmatpush1.bf16.msra.mxu1 %v2858_v8  ;;  %1646 = vmatprep.subr.bf16.mxu0 %v2859_v9  ;;  %v2867_v14 = vld [vmem:[#allocation6 + $0x284] ss:$16 sps:$4 sm:$0xff]   ;;  %v2870_v16 = vld [vmem:[#allocation6 + $0x280] ss:$16 sps:$4 sm:$0xff]  }
  0x31   :  { %1687 = vmatprep.subr.bf16.mxu1 %v2861_v10  ;;  %v2871_v17 = vld [vmem:[#allocation6 + $0x64] ss:$16 sps:$4 sm:$0xff]   ;;  %v2875_v19 = vld [vmem:[#allocation6 + $0x60] ss:$16 sps:$4 sm:$0xff]  }
  0x32   :  { %v2873_v18 = vld [vmem:[#allocation6 + $0x264] ss:$16 sps:$4 sm:$0xff]   ;;  %v2876_v20 = vld [vmem:[#allocation6 + $0x260] ss:$16 sps:$4 sm:$0xff]  }
  0x33   :  { %1647 = vmatpush1.bf16.msra.mxu0 %v2863_v11  ;;  %v2877_v21 = vld [vmem:[#allocation6 + $0x44] ss:$16 sps:$4 sm:$0xff]   ;;  %v2881_v23 = vld [vmem:[#allocation6 + $0x40] ss:$16 sps:$4 sm:$0xff]  }
  0x34   :  { %1688 = vmatpush1.bf16.msra.mxu1 %v2864_v12  ;;  %1648 = vmatprep.subr.bf16.mxu0 %v2865_v13  ;;  %v2879_v22 = vld [vmem:[#allocation6 + $0x244] ss:$16 sps:$4 sm:$0xff]   ;;  %v2882_v24 = vld [vmem:[#allocation6 + $0x240] ss:$16 sps:$4 sm:$0xff]  }
  0x35   :  { %1689 = vmatprep.subr.bf16.mxu1 %v2867_v14  ;;  %v2883_v25 = vld [vmem:[#allocation6 + $0x24] ss:$16 sps:$4 sm:$0xff]   ;;  %v2887_v27 = vld [vmem:[#allocation6 + $0x20] ss:$16 sps:$4 sm:$0xff]  }
  0x36   :  { %v2885_v26 = vld [vmem:[#allocation6 + $0x224] ss:$16 sps:$4 sm:$0xff]   ;;  %v2888_v28 = vld [vmem:[#allocation6 + $0x220] ss:$16 sps:$4 sm:$0xff]  }
  0x37   :  { %1649 = vmatpush1.bf16.msra.mxu0 %v2869_v15  ;;  %v2889_v29 = vld [vmem:[#allocation6 + $0x4] ss:$16 sps:$4 sm:$0xff]   ;;  %v2893_v31 = vld [vmem:[#allocation6] ss:$16 sps:$4 sm:$0xff]  }
  0x38   :  { %1690 = vmatpush1.bf16.msra.mxu1 %v2870_v16  ;;  %1650 = vmatprep.subr.bf16.mxu0 %v2871_v17  ;;  %v2891_v30 = vld [vmem:[#allocation6 + $0x204] ss:$16 sps:$4 sm:$0xff]   ;;  %v2894_v32 = vld [vmem:[#allocation6 + $0x200] ss:$16 sps:$4 sm:$0xff]  }
  0x39   :  { %1691 = vmatprep.subr.bf16.mxu1 %v2873_v18  ;;  %v2895_v33 = vld [vmem:[#allocation6 + $0x1e4] ss:$16 sps:$4 sm:$0xff]   ;;  %v2899_v35 = vld [vmem:[#allocation6 + $0x1e0] ss:$16 sps:$4 sm:$0xff]  }
  0x3a   :  { %v2897_v34 = vld [vmem:[#allocation6 + $0x3e4] ss:$16 sps:$4 sm:$0xff]   ;;  %v2900_v36 = vld [vmem:[#allocation6 + $0x3e0] ss:$16 sps:$4 sm:$0xff]  }
  0x3b   :  { %1651 = vmatpush1.bf16.msra.mxu0 %v2875_v19  ;;  %v2901_v37 = vld [vmem:[#allocation6 + $0x1c4] ss:$16 sps:$4 sm:$0xff]   ;;  %v2905_v39 = vld [vmem:[#allocation6 + $0x1c0] ss:$16 sps:$4 sm:$0xff]  }
  0x3c   :  { %1692 = vmatpush1.bf16.msra.mxu1 %v2876_v20  ;;  %1652 = vmatprep.subr.bf16.mxu0 %v2877_v21  ;;  %v2903_v38 = vld [vmem:[#allocation6 + $0x3c4] ss:$16 sps:$4 sm:$0xff]   ;;  %v2906_v40 = vld [vmem:[#allocation6 + $0x3c0] ss:$16 sps:$4 sm:$0xff]  }
  0x3d   :  { %1693 = vmatprep.subr.bf16.mxu1 %v2879_v22  ;;  %v2907_v41 = vld [vmem:[#allocation6 + $0x1a4] ss:$16 sps:$4 sm:$0xff]   ;;  %v2911_v43 = vld [vmem:[#allocation6 + $0x1a0] ss:$16 sps:$4 sm:$0xff]  }
  0x3e   :  { %v2909_v42 = vld [vmem:[#allocation6 + $0x3a4] ss:$16 sps:$4 sm:$0xff]   ;;  %v2912_v44 = vld [vmem:[#allocation6 + $0x3a0] ss:$16 sps:$4 sm:$0xff]  }
  0x3f   :  { %1653 = vmatpush1.bf16.msra.mxu0 %v2881_v23  ;;  %v2913_v45 = vld [vmem:[#allocation6 + $0x184] ss:$16 sps:$4 sm:$0xff]   ;;  %v2917_v48 = vld [vmem:[#allocation6 + $0x180] ss:$16 sps:$4 sm:$0xff]  }
  0x40   :  { %1694 = vmatpush1.bf16.msra.mxu1 %v2882_v24  ;;  %1654 = vmatprep.subr.bf16.mxu0 %v2883_v25  ;;  %v2915_v46 = vld [vmem:[#allocation6 + $0x384] ss:$16 sps:$4 sm:$0xff]   ;;  %v2918_v49 = vld [vmem:[#allocation6 + $0x380] ss:$16 sps:$4 sm:$0xff]  }
  0x41   :  { %1695 = vmatprep.subr.bf16.mxu1 %v2885_v26  ;;  %v2919_v52 = vld [vmem:[#allocation6 + $0x164] ss:$16 sps:$4 sm:$0xff]   ;;  %v2923_v55 = vld [vmem:[#allocation6 + $0x160] ss:$16 sps:$4 sm:$0xff]  }
  0x42   :  { %v2921_v54 = vld [vmem:[#allocation6 + $0x364] ss:$16 sps:$4 sm:$0xff]   ;;  %v2924_v56 = vld [vmem:[#allocation6 + $0x360] ss:$16 sps:$4 sm:$0xff]  }
  0x43   :  { %1655 = vmatpush1.bf16.msra.mxu0 %v2887_v27  ;;  %v2925_v57 = vld [vmem:[#allocation6 + $0x144] ss:$16 sps:$4 sm:$0xff]   ;;  %v2929_v59 = vld [vmem:[#allocation6 + $0x140] ss:$16 sps:$4 sm:$0xff]  }
  0x44   :  { %1696 = vmatpush1.bf16.msra.mxu1 %v2888_v28  ;;  %1656 = vmatprep.subr.bf16.mxu0 %v2889_v29  ;;  %v2927_v58 = vld [vmem:[#allocation6 + $0x344] ss:$16 sps:$4 sm:$0xff]   ;;  %v2930_v60 = vld [vmem:[#allocation6 + $0x340] ss:$16 sps:$4 sm:$0xff]  }
  0x45   :  { %1697 = vmatprep.subr.bf16.mxu1 %v2891_v30  ;;  %v2931_v61 = vld [vmem:[#allocation6 + $0x124] ss:$16 sps:$4 sm:$0xff]   ;;  %v2935_v63 = vld [vmem:[#allocation6 + $0x120] ss:$16 sps:$4 sm:$0xff]  }
  0x46   :  { %v2933_v62 = vld [vmem:[#allocation6 + $0x324] ss:$16 sps:$4 sm:$0xff]   ;;  %v2936_v0 = vld [vmem:[#allocation6 + $0x320] ss:$16 sps:$4 sm:$0xff]  }
  0x47   :  { %1657 = vmatpush1.bf16.msra.mxu0 %v2893_v31  ;;  %v2937_v1 = vld [vmem:[#allocation6 + $0x104] ss:$16 sps:$4 sm:$0xff]   ;;  %v2941_v3 = vld [vmem:[#allocation6 + $0x100] ss:$16 sps:$4 sm:$0xff]  }
  0x48   :  { %1698 = vmatpush1.bf16.msra.mxu1 %v2894_v32  ;;  %1658 = vmatprep.subr.bf16.mxu0 %v2895_v33  ;;  %v2939_v2 = vld [vmem:[#allocation6 + $0x304] ss:$16 sps:$4 sm:$0xff]   ;;  %v2942_v4 = vld [vmem:[#allocation6 + $0x300] ss:$16 sps:$4 sm:$0xff]  }
  0x49   :  { %1699 = vmatprep.subr.bf16.mxu1 %v2897_v34  ;;  %v68_v5 = vld [vmem:[#allocation3] sm:$0xff]  ;;  %v70_v6 = vld [vmem:[#allocation3 + $0x10] sm:$0xff] }
  0x4a   :  { %v2945_v7 = vld [vmem:[#allocation6 + $0x4e4] ss:$16 sps:$4 sm:$0xff]   ;;  %v3483_v9 = vpack.c.bf16 %v68_v5, %v68_v5  ;;  %v3485_v10 = vpack.c.bf16 %v70_v6, %v70_v6  ;;  %v2943_v11 = vld [vmem:[#allocation6 + $0x4e0] ss:$16 sps:$4 sm:$0xff]  }
  0x4b   :  { %1659 = vmatpush2.bf16.msra.mxu0 %v2899_v35  ;;  %v2948_v8 = vld [vmem:[#allocation6 + $0x6e4] ss:$16 sps:$4 sm:$0xff]   ;;  %v2946_v12 = vld [vmem:[#allocation6 + $0x6e0] ss:$16 sps:$4 sm:$0xff]   ;;  %v73_v35 = vld [vmem:[#allocation3 + $0x28] sm:$0xff] }
  0x4c   :  { %1700 = vmatpush2.bf16.msra.mxu1 %v2900_v36  ;;  %1660 = vmatprep.subr.bf16.mxu0 %v2901_v37  ;;  %v2951_v13 = vld [vmem:[#allocation6 + $0x4c4] ss:$16 sps:$4 sm:$0xff]   ;;  %v2949_v15 = vld [vmem:[#allocation6 + $0x4c0] ss:$16 sps:$4 sm:$0xff]  }
  0x4d   :  { %1701 = vmatprep.subr.bf16.mxu1 %v2903_v38  ;;  %v2954_v14 = vld [vmem:[#allocation6 + $0x6c4] ss:$16 sps:$4 sm:$0xff]   ;;  %v2952_v16 = vld [vmem:[#allocation6 + $0x6c0] ss:$16 sps:$4 sm:$0xff]   ;;  %v3489_v38 = vpack.c.bf16 %v73_v35, %v73_v35  ;;  %v3057_v35 = vld [vmem:[#allocation6 + $0x88] ss:$16 sps:$4 sm:$0xff]  }
  0x4e   :  { %v2957_v17 = vld [vmem:[#allocation6 + $0x4a4] ss:$16 sps:$4 sm:$0xff]   ;;  %v2955_v19 = vld [vmem:[#allocation6 + $0x4a0] ss:$16 sps:$4 sm:$0xff]  }
  0x4f   :  { %1661 = vmatpush2.bf16.msra.mxu0 %v2905_v39  ;;  %v2960_v18 = vld [vmem:[#allocation6 + $0x6a4] ss:$16 sps:$4 sm:$0xff]   ;;  %v2958_v20 = vld [vmem:[#allocation6 + $0x6a0] ss:$16 sps:$4 sm:$0xff]   ;;  %v75_v39 = vld [vmem:[#allocation3 + $0x38] sm:$0xff] }
  0x50   :  { %1702 = vmatpush2.bf16.msra.mxu1 %v2906_v40  ;;  %1662 = vmatprep.subr.bf16.mxu0 %v2907_v41  ;;  %v2963_v21 = vld [vmem:[#allocation6 + $0x484] ss:$16 sps:$4 sm:$0xff]   ;;  %v2961_v23 = vld [vmem:[#allocation6 + $0x480] ss:$16 sps:$4 sm:$0xff]   ;;  %v3491_v41 = vpack.c.bf16 %v75_v39, %v75_v39  ;;  %v3068_v39 = vld [vmem:[#allocation6 + $0x26c] ss:$16 sps:$4 sm:$0xff]  }
  0x51   :  { %1703 = vmatprep.subr.bf16.mxu1 %v2909_v42  ;;  %v2966_v22 = vld [vmem:[#allocation6 + $0x684] ss:$16 sps:$4 sm:$0xff]   ;;  %v2964_v24 = vld [vmem:[#allocation6 + $0x680] ss:$16 sps:$4 sm:$0xff]  }
  0x52   :  { %v2969_v25 = vld [vmem:[#allocation6 + $0x464] ss:$16 sps:$4 sm:$0xff]   ;;  %v2967_v27 = vld [vmem:[#allocation6 + $0x460] ss:$16 sps:$4 sm:$0xff]  }
  0x53   :  { %1663 = vmatpush2.bf16.msra.mxu0 %v2911_v43  ;;  %v2972_v26 = vld [vmem:[#allocation6 + $0x664] ss:$16 sps:$4 sm:$0xff]   ;;  %v2970_v28 = vld [vmem:[#allocation6 + $0x660] ss:$16 sps:$4 sm:$0xff]  }
  0x54   :  { %1704 = vmatpush2.bf16.msra.mxu1 %v2912_v44  ;;  %1664 = vmatprep.subr.bf16.mxu0 %v2913_v45  ;;  %v2975_v29 = vld [vmem:[#allocation6 + $0x444] ss:$16 sps:$4 sm:$0xff]   ;;  %v2973_v31 = vld [vmem:[#allocation6 + $0x440] ss:$16 sps:$4 sm:$0xff]  }
  0x55   :  { %1705 = vmatprep.subr.bf16.mxu1 %v2915_v46  ;;  %v2978_v30 = vld [vmem:[#allocation6 + $0x644] ss:$16 sps:$4 sm:$0xff]   ;;  %v2976_v32 = vld [vmem:[#allocation6 + $0x640] ss:$16 sps:$4 sm:$0xff]  }
  0x56   :  { %v2981_v33 = vld [vmem:[#allocation6 + $0x424] ss:$16 sps:$4 sm:$0xff]   ;;  %v2979_v36 = vld [vmem:[#allocation6 + $0x420] ss:$16 sps:$4 sm:$0xff]  }
  0x57   :  { %1665 = vmatpush2.bf16.msra.mxu0 %v2917_v48  ;;  %v2984_v34 = vld [vmem:[#allocation6 + $0x624] ss:$16 sps:$4 sm:$0xff]   ;;  %v2982_v37 = vld [vmem:[#allocation6 + $0x620] ss:$16 sps:$4 sm:$0xff]  }
  0x58   :  { %1706 = vmatpush2.bf16.msra.mxu1 %v2918_v49  ;;  %1666 = vmatprep.subr.bf16.mxu0 %v2919_v52  ;;  %v2987_v40 = vld [vmem:[#allocation6 + $0x404] ss:$16 sps:$4 sm:$0xff]   ;;  %v2985_v43 = vld [vmem:[#allocation6 + $0x400] ss:$16 sps:$4 sm:$0xff]  }
  0x59   :  { %1707 = vmatprep.subr.bf16.mxu1 %v2921_v54  ;;  %v2990_v42 = vld [vmem:[#allocation6 + $0x604] ss:$16 sps:$4 sm:$0xff]   ;;  %v2988_v44 = vld [vmem:[#allocation6 + $0x600] ss:$16 sps:$4 sm:$0xff]  }
  0x5a   :  { %v2993_v45 = vld [vmem:[#allocation6 + $0x5e4] ss:$16 sps:$4 sm:$0xff]   ;;  %v2991_v47 = vld [vmem:[#allocation6 + $0x5e0] ss:$16 sps:$4 sm:$0xff]  }
  0x5b   :  { %1667 = vmatpush2.bf16.msra.mxu0 %v2923_v55  ;;  %v2996_v46 = vld [vmem:[#allocation6 + $0x7e4] ss:$16 sps:$4 sm:$0xff]   ;;  %v2994_v48 = vld [vmem:[#allocation6 + $0x7e0] ss:$16 sps:$4 sm:$0xff]  }
  0x5c   :  { %1708 = vmatpush2.bf16.msra.mxu1 %v2924_v56  ;;  %1668 = vmatprep.subr.bf16.mxu0 %v2925_v57  ;;  %v2999_v49 = vld [vmem:[#allocation6 + $0x5c4] ss:$16 sps:$4 sm:$0xff]   ;;  %v2997_v52 = vld [vmem:[#allocation6 + $0x5c0] ss:$16 sps:$4 sm:$0xff]  }
  0x5d   :  { %1709 = vmatprep.subr.bf16.mxu1 %v2927_v58  ;;  %v3002_v51 = vld [vmem:[#allocation6 + $0x7c4] ss:$16 sps:$4 sm:$0xff]   ;;  %v3000_v54 = vld [vmem:[#allocation6 + $0x7c0] ss:$16 sps:$4 sm:$0xff]  }
  0x5e   :  { %v3005_v55 = vld [vmem:[#allocation6 + $0x5a4] ss:$16 sps:$4 sm:$0xff]   ;;  %v3003_v57 = vld [vmem:[#allocation6 + $0x5a0] ss:$16 sps:$4 sm:$0xff]  }
  0x5f   :  { %1669 = vmatpush2.bf16.msra.mxu0 %v2929_v59  ;;  %v3008_v56 = vld [vmem:[#allocation6 + $0x7a4] ss:$16 sps:$4 sm:$0xff]   ;;  %v3006_v58 = vld [vmem:[#allocation6 + $0x7a0] ss:$16 sps:$4 sm:$0xff]  }
  0x60   :  { %1710 = vmatpush2.bf16.msra.mxu1 %v2930_v60  ;;  %1670 = vmatprep.subr.bf16.mxu0 %v2931_v61  ;;  %v3011_v59 = vld [vmem:[#allocation6 + $0x584] ss:$16 sps:$4 sm:$0xff]   ;;  %v3009_v61 = vld [vmem:[#allocation6 + $0x580] ss:$16 sps:$4 sm:$0xff]  }
  0x61   :  { %1711 = vmatprep.subr.bf16.mxu1 %v2933_v62  ;;  %v3014_v60 = vld [vmem:[#allocation6 + $0x784] ss:$16 sps:$4 sm:$0xff]   ;;  %v3012_v62 = vld [vmem:[#allocation6 + $0x780] ss:$16 sps:$4 sm:$0xff]  }
  0x62   :  { %v3021_v5 = vld [vmem:[#allocation6 + $0x540] ss:$16 sps:$4 sm:$0xff]  }
  0x63   :  { %1671 = vmatpush2.bf16.msra.mxu0 %v2935_v63  ;;  %v3017_v63 = vld [vmem:[#allocation6 + $0x564] ss:$16 sps:$4 sm:$0xff]   ;;  %v3024_v6 = vld [vmem:[#allocation6 + $0x740] ss:$16 sps:$4 sm:$0xff]  }
  0x64   :  { %1712 = vmatpush2.bf16.msra.mxu1 %v2936_v0  ;;  %1672 = vmatprep.subr.bf16.mxu0 %v2937_v1  ;;  %v3020_v0 = vld [vmem:[#allocation6 + $0x764] ss:$16 sps:$4 sm:$0xff]   ;;  %v3015_v1 = vld [vmem:[#allocation6 + $0x560] ss:$16 sps:$4 sm:$0xff]  }
  0x65   :  { %1713 = vmatprep.subr.bf16.mxu1 %v2939_v2  ;;  %v3018_v2 = vld [vmem:[#allocation6 + $0x760] ss:$16 sps:$4 sm:$0xff]  }
  0x67   :  { %1673 = vmatpush2.bf16.msra.mxu0 %v2941_v3  ;;  %v3023_v3 = vld [vmem:[#allocation6 + $0x544] ss:$16 sps:$4 sm:$0xff]  }
  0x68   :  { %1714 = vmatpush2.bf16.msra.mxu1 %v2942_v4  ;;  %1724 = vmatprep.subr.bf16.mxu0 %v2945_v7  ;;  %v3026_v4 = vld [vmem:[#allocation6 + $0x744] ss:$16 sps:$4 sm:$0xff]  }
  0x69   :  { %1765 = vmatprep.subr.bf16.mxu1 %v2948_v8  ;;  %v3029_v7 = vld [vmem:[#allocation6 + $0x524] ss:$16 sps:$4 sm:$0xff]  }
  0x6a   :  { %1675 = vmatmul.mubr.bf16.vlgmr.msra.gmra.mxu0 %v3483_v9  ;;  %v3032_v8 = vld [vmem:[#allocation6 + $0x724] ss:$16 sps:$4 sm:$0xff]  }
  0x6b   :  { %1716 = vmatmul.mubr.bf16.vlgmr.msra.gmra.mxu1 %v3485_v10  ;;  %1725 = vmatpush1.bf16.msra.mxu0 %v2943_v11  ;;  %v3027_v11 = vld [vmem:[#allocation6 + $0x520] ss:$16 sps:$4 sm:$0xff]  }
  0x6c   :  { %1766 = vmatpush1.bf16.msra.mxu1 %v2946_v12  ;;  %1726 = vmatprep.subr.bf16.mxu0 %v2951_v13  ;;  %v3030_v12 = vld [vmem:[#allocation6 + $0x720] ss:$16 sps:$4 sm:$0xff]   ;;  %v3035_v13 = vld [vmem:[#allocation6 + $0x504] ss:$16 sps:$4 sm:$0xff]  }
  0x6d   :  { %1767 = vmatprep.subr.bf16.mxu1 %v2954_v14  ;;  %1756 = vmatprep.mubr.bf16.mxu0 %v3489_v38  ;;  %v3038_v14 = vld [vmem:[#allocation6 + $0x704] ss:$16 sps:$4 sm:$0xff]  }
  0x6e   :  { %1797 = vmatprep.mubr.bf16.mxu1 %v3491_v41 }
  0x6f   :  { %1727 = vmatpush1.bf16.msra.mxu0 %v2949_v15  ;;  %v3033_v15 = vld [vmem:[#allocation6 + $0x500] ss:$16 sps:$4 sm:$0xff]  }
  0x70   :  { %1768 = vmatpush1.bf16.msra.mxu1 %v2952_v16  ;;  %1728 = vmatprep.subr.bf16.mxu0 %v2957_v17  ;;  %v3036_v16 = vld [vmem:[#allocation6 + $0x700] ss:$16 sps:$4 sm:$0xff]  }
  0x71   :  { %1769 = vmatprep.subr.bf16.mxu1 %v2960_v18  ;;  %v72_v17 = vld [vmem:[#allocation3 + $0x20] sm:$0xff]  ;;  %v74_v18 = vld [vmem:[#allocation3 + $0x30] sm:$0xff] }
  0x73   :  { %1729 = vmatpush1.bf16.msra.mxu0 %v2955_v19  ;;  %v3041_v19 = vld [vmem:[#allocation6 + $0xec] ss:$16 sps:$4 sm:$0xff]  }
  0x74   :  { %1770 = vmatpush1.bf16.msra.mxu1 %v2958_v20  ;;  %1730 = vmatprep.subr.bf16.mxu0 %v2963_v21  ;;  %v3044_v20 = vld [vmem:[#allocation6 + $0x2ec] ss:$16 sps:$4 sm:$0xff]   ;;  %v3495_v21 = vpack.c.bf16 %v72_v17, %v72_v17 }
  0x75   :  { %1771 = vmatprep.subr.bf16.mxu1 %v2966_v22  ;;  %v3497_v22 = vpack.c.bf16 %v74_v18, %v74_v18  ;;  %v3125_v17 = vld [vmem:[#allocation6 + $0x12c] ss:$16 sps:$4 sm:$0xff]  }
  0x76   :  { %v3128_v18 = vld [vmem:[#allocation6 + $0x32c] ss:$16 sps:$4 sm:$0xff]  }
  0x77   :  { %1731 = vmatpush1.bf16.msra.mxu0 %v2961_v23  ;;  %v3039_v23 = vld [vmem:[#allocation6 + $0xe8] ss:$16 sps:$4 sm:$0xff]  }
  0x78   :  { %1772 = vmatpush1.bf16.msra.mxu1 %v2964_v24  ;;  %1732 = vmatprep.subr.bf16.mxu0 %v2969_v25  ;;  %v3042_v24 = vld [vmem:[#allocation6 + $0x2e8] ss:$16 sps:$4 sm:$0xff]   ;;  %v3047_v25 = vld [vmem:[#allocation6 + $0xcc] ss:$16 sps:$4 sm:$0xff]  }
  0x79   :  { %1773 = vmatprep.subr.bf16.mxu1 %v2972_v26  ;;  %v3050_v26 = vld [vmem:[#allocation6 + $0x2cc] ss:$16 sps:$4 sm:$0xff]  }
  0x7b   :  { %1733 = vmatpush1.bf16.msra.mxu0 %v2967_v27  ;;  %v3045_v27 = vld [vmem:[#allocation6 + $0xc8] ss:$16 sps:$4 sm:$0xff]  }
  0x7c   :  { %1774 = vmatpush1.bf16.msra.mxu1 %v2970_v28  ;;  %1734 = vmatprep.subr.bf16.mxu0 %v2975_v29  ;;  %v3048_v28 = vld [vmem:[#allocation6 + $0x2c8] ss:$16 sps:$4 sm:$0xff]   ;;  %v3053_v29 = vld [vmem:[#allocation6 + $0xac] ss:$16 sps:$4 sm:$0xff]  }
  0x7d   :  { %1775 = vmatprep.subr.bf16.mxu1 %v2978_v30  ;;  %v3056_v30 = vld [vmem:[#allocation6 + $0x2ac] ss:$16 sps:$4 sm:$0xff]  }
  0x7f   :  { %1735 = vmatpush1.bf16.msra.mxu0 %v2973_v31  ;;  %v3051_v31 = vld [vmem:[#allocation6 + $0xa8] ss:$16 sps:$4 sm:$0xff]  }
  0x80   :  { %1776 = vmatpush1.bf16.msra.mxu1 %v2976_v32  ;;  %1736 = vmatprep.subr.bf16.mxu0 %v2981_v33  ;;  %v3054_v32 = vld [vmem:[#allocation6 + $0x2a8] ss:$16 sps:$4 sm:$0xff]   ;;  %v3059_v33 = vld [vmem:[#allocation6 + $0x8c] ss:$16 sps:$4 sm:$0xff]  }
  0x81   :  { %1777 = vmatprep.subr.bf16.mxu1 %v2984_v34  ;;  %v3062_v34 = vld [vmem:[#allocation6 + $0x28c] ss:$16 sps:$4 sm:$0xff]  }
  0x83   :  { %1737 = vmatpush1.bf16.msra.mxu0 %v2979_v36  ;;  %v3060_v36 = vld [vmem:[#allocation6 + $0x288] ss:$16 sps:$4 sm:$0xff]  }
  0x84   :  { %1778 = vmatpush1.bf16.msra.mxu1 %v2982_v37  ;;  %1738 = vmatprep.subr.bf16.mxu0 %v2987_v40  ;;  %v3065_v37 = vld [vmem:[#allocation6 + $0x6c] ss:$16 sps:$4 sm:$0xff]   ;;  %v3063_v40 = vld [vmem:[#allocation6 + $0x68] ss:$16 sps:$4 sm:$0xff]  }
  0x85   :  { %1779 = vmatprep.subr.bf16.mxu1 %v2990_v42  ;;  %v3074_v42 = vld [vmem:[#allocation6 + $0x24c] ss:$16 sps:$4 sm:$0xff]  }
  0x87   :  { %1739 = vmatpush1.bf16.msra.mxu0 %v2985_v43  ;;  %v3069_v43 = vld [vmem:[#allocation6 + $0x48] ss:$16 sps:$4 sm:$0xff]  }
  0x88   :  { %1780 = vmatpush1.bf16.msra.mxu1 %v2988_v44  ;;  %1740 = vmatprep.subr.bf16.mxu0 %v2993_v45  ;;  %v3072_v44 = vld [vmem:[#allocation6 + $0x248] ss:$16 sps:$4 sm:$0xff]   ;;  %v3077_v45 = vld [vmem:[#allocation6 + $0x2c] ss:$16 sps:$4 sm:$0xff]  }
  0x89   :  { %1781 = vmatprep.subr.bf16.mxu1 %v2996_v46  ;;  %v3080_v46 = vld [vmem:[#allocation6 + $0x22c] ss:$16 sps:$4 sm:$0xff]  }
  0x8b   :  { %1741 = vmatpush2.bf16.msra.mxu0 %v2991_v47  ;;  %v3075_v47 = vld [vmem:[#allocation6 + $0x28] ss:$16 sps:$4 sm:$0xff]  }
  0x8c   :  { %1782 = vmatpush2.bf16.msra.mxu1 %v2994_v48  ;;  %1742 = vmatprep.subr.bf16.mxu0 %v2999_v49  ;;  %v3078_v48 = vld [vmem:[#allocation6 + $0x228] ss:$16 sps:$4 sm:$0xff]   ;;  %v3083_v49 = vld [vmem:[#allocation6 + $0xc] ss:$16 sps:$4 sm:$0xff]  }
  0x8d   :  { %1783 = vmatprep.subr.bf16.mxu1 %v3002_v51  ;;  %v3086_v51 = vld [vmem:[#allocation6 + $0x20c] ss:$16 sps:$4 sm:$0xff]  }
  0x8f   :  { %1743 = vmatpush2.bf16.msra.mxu0 %v2997_v52  ;;  %v3081_v52 = vld [vmem:[#allocation6 + $0x8] ss:$16 sps:$4 sm:$0xff]  }
  0x90   :  { %1784 = vmatpush2.bf16.msra.mxu1 %v3000_v54  ;;  %1744 = vmatprep.subr.bf16.mxu0 %v3005_v55  ;;  %v3084_v54 = vld [vmem:[#allocation6 + $0x208] ss:$16 sps:$4 sm:$0xff]   ;;  %v3089_v55 = vld [vmem:[#allocation6 + $0x1ec] ss:$16 sps:$4 sm:$0xff]  }
  0x91   :  { %1785 = vmatprep.subr.bf16.mxu1 %v3008_v56  ;;  %v3092_v56 = vld [vmem:[#allocation6 + $0x3ec] ss:$16 sps:$4 sm:$0xff]  }
  0x93   :  { %1745 = vmatpush2.bf16.msra.mxu0 %v3003_v57  ;;  %v3087_v57 = vld [vmem:[#allocation6 + $0x1e8] ss:$16 sps:$4 sm:$0xff]  }
  0x94   :  { %1786 = vmatpush2.bf16.msra.mxu1 %v3006_v58  ;;  %1746 = vmatprep.subr.bf16.mxu0 %v3011_v59  ;;  %v3090_v58 = vld [vmem:[#allocation6 + $0x3e8] ss:$16 sps:$4 sm:$0xff]   ;;  %v3095_v59 = vld [vmem:[#allocation6 + $0x1cc] ss:$16 sps:$4 sm:$0xff]  }
  0x95   :  { %1787 = vmatprep.subr.bf16.mxu1 %v3014_v60  ;;  %v3098_v60 = vld [vmem:[#allocation6 + $0x3cc] ss:$16 sps:$4 sm:$0xff]  }
  0x97   :  { %1747 = vmatpush2.bf16.msra.mxu0 %v3009_v61  ;;  %v3093_v61 = vld [vmem:[#allocation6 + $0x1c8] ss:$16 sps:$4 sm:$0xff]  }
  0x98   :  { %1788 = vmatpush2.bf16.msra.mxu1 %v3012_v62  ;;  %1748 = vmatprep.subr.bf16.mxu0 %v3017_v63  ;;  %v3096_v62 = vld [vmem:[#allocation6 + $0x3c8] ss:$16 sps:$4 sm:$0xff]   ;;  %v3101_v63 = vld [vmem:[#allocation6 + $0x1ac] ss:$16 sps:$4 sm:$0xff]  }
  0x99   :  { %1789 = vmatprep.subr.bf16.mxu1 %v3020_v0  ;;  %v3104_v0 = vld [vmem:[#allocation6 + $0x3ac] ss:$16 sps:$4 sm:$0xff]  }
  0x9b   :  { %1749 = vmatpush2.bf16.msra.mxu0 %v3015_v1  ;;  %v3099_v1 = vld [vmem:[#allocation6 + $0x1a8] ss:$16 sps:$4 sm:$0xff]  }
  0x9c   :  { %1790 = vmatpush2.bf16.msra.mxu1 %v3018_v2  ;;  %1750 = vmatprep.subr.bf16.mxu0 %v3023_v3  ;;  %v3102_v2 = vld [vmem:[#allocation6 + $0x3a8] ss:$16 sps:$4 sm:$0xff]   ;;  %v3107_v3 = vld [vmem:[#allocation6 + $0x18c] ss:$16 sps:$4 sm:$0xff]  }
  0x9d   :  { %1791 = vmatprep.subr.bf16.mxu1 %v3026_v4  ;;  %v3110_v4 = vld [vmem:[#allocation6 + $0x38c] ss:$16 sps:$4 sm:$0xff]  }
  0x9f   :  { %1751 = vmatpush2.bf16.msra.mxu0 %v3021_v5  ;;  %v3105_v5 = vld [vmem:[#allocation6 + $0x188] ss:$16 sps:$4 sm:$0xff]  }
  0xa0   :  { %1792 = vmatpush2.bf16.msra.mxu1 %v3024_v6  ;;  %1752 = vmatprep.subr.bf16.mxu0 %v3029_v7  ;;  %v3108_v6 = vld [vmem:[#allocation6 + $0x388] ss:$16 sps:$4 sm:$0xff]   ;;  %v3113_v7 = vld [vmem:[#allocation6 + $0x16c] ss:$16 sps:$4 sm:$0xff]  }
  0xa1   :  { %1793 = vmatprep.subr.bf16.mxu1 %v3032_v8  ;;  %v3116_v8 = vld [vmem:[#allocation6 + $0x36c] ss:$16 sps:$4 sm:$0xff]  }
  0xa3   :  { %1753 = vmatpush2.bf16.msra.mxu0 %v3027_v11  ;;  %v3111_v11 = vld [vmem:[#allocation6 + $0x168] ss:$16 sps:$4 sm:$0xff]  }
  0xa4   :  { %1794 = vmatpush2.bf16.msra.mxu1 %v3030_v12  ;;  %1754 = vmatprep.subr.bf16.mxu0 %v3035_v13  ;;  %v3114_v12 = vld [vmem:[#allocation6 + $0x368] ss:$16 sps:$4 sm:$0xff]   ;;  %v3119_v13 = vld [vmem:[#allocation6 + $0x14c] ss:$16 sps:$4 sm:$0xff]  }
  0xa5   :  { %1795 = vmatprep.subr.bf16.mxu1 %v3038_v14  ;;  %v3122_v14 = vld [vmem:[#allocation6 + $0x34c] ss:$16 sps:$4 sm:$0xff]  }
  0xa7   :  { %1755 = vmatpush2.bf16.msra.mxu0 %v3033_v15  ;;  %v3117_v15 = vld [vmem:[#allocation6 + $0x148] ss:$16 sps:$4 sm:$0xff]  }
  0xa8   :  { %1796 = vmatpush2.bf16.msra.mxu1 %v3036_v16  ;;  %1806 = vmatprep.subr.bf16.mxu0 %v3041_v19  ;;  %v3120_v16 = vld [vmem:[#allocation6 + $0x348] ss:$16 sps:$4 sm:$0xff]  }
  0xa9   :  { %1847 = vmatprep.subr.bf16.mxu1 %v3044_v20  ;;  %v3123_v19 = vld [vmem:[#allocation6 + $0x128] ss:$16 sps:$4 sm:$0xff]  }
  0xaa   :  { %1757 = vmatmul.mubr.bf16.vlgmr.msra.gmra.mxu0 %v3495_v21  ;;  %v3126_v20 = vld [vmem:[#allocation6 + $0x328] ss:$16 sps:$4 sm:$0xff]  }
  0xab   :  { %1798 = vmatmul.mubr.bf16.vlgmr.msra.gmra.mxu1 %v3497_v22  ;;  %1807 = vmatpush1.bf16.msra.mxu0 %v3039_v23  ;;  %v3131_v23 = vld [vmem:[#allocation6 + $0x10c] ss:$16 sps:$4 sm:$0xff]  }
  0xac   :  { %1848 = vmatpush1.bf16.msra.mxu1 %v3042_v24  ;;  %1808 = vmatprep.subr.bf16.mxu0 %v3047_v25  ;;  %v3134_v24 = vld [vmem:[#allocation6 + $0x30c] ss:$16 sps:$4 sm:$0xff]   ;;  %v3129_v25 = vld [vmem:[#allocation6 + $0x108] ss:$16 sps:$4 sm:$0xff]  }
  0xad   :  { %1849 = vmatprep.subr.bf16.mxu1 %v3050_v26  ;;  %1838 = vmatprep.mubr.bf16.mxu0 %v3477_v50  ;;  %v3066_v50 = vld [vmem:[#allocation6 + $0x268] ss:$16 sps:$4 sm:$0xff]  }
  0xae   :  { %1879 = vmatprep.mubr.bf16.mxu1 %v3479_v53  ;;  %v3071_v53 = vld [vmem:[#allocation6 + $0x4c] ss:$16 sps:$4 sm:$0xff]   ;;  %v3132_v26 = vld [vmem:[#allocation6 + $0x308] ss:$16 sps:$4 sm:$0xff]  }
  0xaf   :  { %1809 = vmatpush1.bf16.msra.mxu0 %v3045_v27  ;;  %v3137_v27 = vld [vmem:[#allocation6 + $0x4ec] ss:$16 sps:$4 sm:$0xff]  }
  0xb0   :  { %1850 = vmatpush1.bf16.msra.mxu1 %v3048_v28  ;;  %1810 = vmatprep.subr.bf16.mxu0 %v3053_v29  ;;  %v3140_v28 = vld [vmem:[#allocation6 + $0x6ec] ss:$16 sps:$4 sm:$0xff]   ;;  %v3135_v29 = vld [vmem:[#allocation6 + $0x4e8] ss:$16 sps:$4 sm:$0xff]  }
  0xb1   :  { %1851 = vmatprep.subr.bf16.mxu1 %v3056_v30  ;;  %v3138_v30 = vld [vmem:[#allocation6 + $0x6e8] ss:$16 sps:$4 sm:$0xff]  }
  0xb3   :  { %1811 = vmatpush1.bf16.msra.mxu0 %v3051_v31  ;;  %v3143_v31 = vld [vmem:[#allocation6 + $0x4cc] ss:$16 sps:$4 sm:$0xff]  }
  0xb4   :  { %1852 = vmatpush1.bf16.msra.mxu1 %v3054_v32  ;;  %1812 = vmatprep.subr.bf16.mxu0 %v3059_v33  ;;  %v3146_v32 = vld [vmem:[#allocation6 + $0x6cc] ss:$16 sps:$4 sm:$0xff]   ;;  %v3141_v33 = vld [vmem:[#allocation6 + $0x4c8] ss:$16 sps:$4 sm:$0xff]  }
  0xb5   :  { %1853 = vmatprep.subr.bf16.mxu1 %v3062_v34  ;;  %v3144_v34 = vld [vmem:[#allocation6 + $0x6c8] ss:$16 sps:$4 sm:$0xff]  }
  0xb7   :  { %1813 = vmatpush1.bf16.msra.mxu0 %v3057_v35  ;;  %v3149_v35 = vld [vmem:[#allocation6 + $0x4ac] ss:$16 sps:$4 sm:$0xff]  }
  0xb8   :  { %1854 = vmatpush1.bf16.msra.mxu1 %v3060_v36  ;;  %1814 = vmatprep.subr.bf16.mxu0 %v3065_v37  ;;  %v3152_v36 = vld [vmem:[#allocation6 + $0x6ac] ss:$16 sps:$4 sm:$0xff]   ;;  %v3147_v37 = vld [vmem:[#allocation6 + $0x4a8] ss:$16 sps:$4 sm:$0xff]  }
  0xb9   :  { %1855 = vmatprep.subr.bf16.mxu1 %v3068_v39  ;;  %v3150_v39 = vld [vmem:[#allocation6 + $0x6a8] ss:$16 sps:$4 sm:$0xff]  }
  0xbb   :  { %1815 = vmatpush1.bf16.msra.mxu0 %v3063_v40  ;;  %v3155_v40 = vld [vmem:[#allocation6 + $0x48c] ss:$16 sps:$4 sm:$0xff]  }
  0xbc   :  { %1856 = vmatpush1.bf16.msra.mxu1 %v3066_v50  ;;  %1816 = vmatprep.subr.bf16.mxu0 %v3071_v53  ;;  %v3158_v50 = vld [vmem:[#allocation6 + $0x68c] ss:$16 sps:$4 sm:$0xff]  }
  0xbd   :  { %1857 = vmatprep.subr.bf16.mxu1 %v3074_v42  ;;  %v3161_v53 = vld [vmem:[#allocation6 + $0x46c] ss:$16 sps:$4 sm:$0xff]  }
  0xbe   :  { %v3164_v42 = vld [vmem:[#allocation6 + $0x66c] ss:$16 sps:$4 sm:$0xff]  }
  0xbf   :  { %1817 = vmatpush1.bf16.msra.mxu0 %v3069_v43  ;;  %v3159_v43 = vld [vmem:[#allocation6 + $0x468] ss:$16 sps:$4 sm:$0xff]  }
  0xc0   :  { %1858 = vmatpush1.bf16.msra.mxu1 %v3072_v44  ;;  %1818 = vmatprep.subr.bf16.mxu0 %v3077_v45  ;;  %v3170_v44 = vld [vmem:[#allocation6 + $0x64c] ss:$16 sps:$4 sm:$0xff]   ;;  %v3165_v45 = vld [vmem:[#allocation6 + $0x448] ss:$16 sps:$4 sm:$0xff]  }
  0xc1   :  { %1859 = vmatprep.subr.bf16.mxu1 %v3080_v46  ;;  %v3168_v46 = vld [vmem:[#allocation6 + $0x648] ss:$16 sps:$4 sm:$0xff]  }
  0xc3   :  { %1819 = vmatpush1.bf16.msra.mxu0 %v3075_v47  ;;  %v3173_v47 = vld [vmem:[#allocation6 + $0x42c] ss:$16 sps:$4 sm:$0xff]  }
  0xc4   :  { %1860 = vmatpush1.bf16.msra.mxu1 %v3078_v48  ;;  %1820 = vmatprep.subr.bf16.mxu0 %v3083_v49  ;;  %v3176_v48 = vld [vmem:[#allocation6 + $0x62c] ss:$16 sps:$4 sm:$0xff]   ;;  %v3171_v49 = vld [vmem:[#allocation6 + $0x428] ss:$16 sps:$4 sm:$0xff]  }
  0xc5   :  { %1861 = vmatprep.subr.bf16.mxu1 %v3086_v51  ;;  %v3174_v51 = vld [vmem:[#allocation6 + $0x628] ss:$16 sps:$4 sm:$0xff]  }
  0xc7   :  { %1821 = vmatpush1.bf16.msra.mxu0 %v3081_v52  ;;  %v3179_v52 = vld [vmem:[#allocation6 + $0x40c] ss:$16 sps:$4 sm:$0xff]  }
  0xc8   :  { %1862 = vmatpush1.bf16.msra.mxu1 %v3084_v54  ;;  %1822 = vmatprep.subr.bf16.mxu0 %v3089_v55  ;;  %v3182_v54 = vld [vmem:[#allocation6 + $0x60c] ss:$16 sps:$4 sm:$0xff]   ;;  %v3177_v55 = vld [vmem:[#allocation6 + $0x408] ss:$16 sps:$4 sm:$0xff]  }
  0xc9   :  { %1863 = vmatprep.subr.bf16.mxu1 %v3092_v56  ;;  %v3180_v56 = vld [vmem:[#allocation6 + $0x608] ss:$16 sps:$4 sm:$0xff]  }
  0xcb   :  { %1823 = vmatpush2.bf16.msra.mxu0 %v3087_v57  ;;  %v3185_v57 = vld [vmem:[#allocation6 + $0x5ec] ss:$16 sps:$4 sm:$0xff]  }
  0xcc   :  { %1864 = vmatpush2.bf16.msra.mxu1 %v3090_v58  ;;  %1824 = vmatprep.subr.bf16.mxu0 %v3095_v59  ;;  %v3188_v58 = vld [vmem:[#allocation6 + $0x7ec] ss:$16 sps:$4 sm:$0xff]   ;;  %v3183_v59 = vld [vmem:[#allocation6 + $0x5e8] ss:$16 sps:$4 sm:$0xff]  }
  0xcd   :  { %1865 = vmatprep.subr.bf16.mxu1 %v3098_v60  ;;  %v3186_v60 = vld [vmem:[#allocation6 + $0x7e8] ss:$16 sps:$4 sm:$0xff]  }
  0xcf   :  { %1825 = vmatpush2.bf16.msra.mxu0 %v3093_v61  ;;  %v3191_v61 = vld [vmem:[#allocation6 + $0x5cc] ss:$16 sps:$4 sm:$0xff]  }
  0xd0   :  { %1866 = vmatpush2.bf16.msra.mxu1 %v3096_v62  ;;  %1826 = vmatprep.subr.bf16.mxu0 %v3101_v63  ;;  %v3194_v62 = vld [vmem:[#allocation6 + $0x7cc] ss:$16 sps:$4 sm:$0xff]   ;;  %v3189_v63 = vld [vmem:[#allocation6 + $0x5c8] ss:$16 sps:$4 sm:$0xff]  }
  0xd1   :  { %1867 = vmatprep.subr.bf16.mxu1 %v3104_v0  ;;  %v3192_v0 = vld [vmem:[#allocation6 + $0x7c8] ss:$16 sps:$4 sm:$0xff]  }
  0xd3   :  { %1827 = vmatpush2.bf16.msra.mxu0 %v3099_v1  ;;  %v3197_v1 = vld [vmem:[#allocation6 + $0x5ac] ss:$16 sps:$4 sm:$0xff]  }
  0xd4   :  { %1868 = vmatpush2.bf16.msra.mxu1 %v3102_v2  ;;  %1828 = vmatprep.subr.bf16.mxu0 %v3107_v3  ;;  %v3200_v2 = vld [vmem:[#allocation6 + $0x7ac] ss:$16 sps:$4 sm:$0xff]   ;;  %v3195_v3 = vld [vmem:[#allocation6 + $0x5a8] ss:$16 sps:$4 sm:$0xff]  }
  0xd5   :  { %1869 = vmatprep.subr.bf16.mxu1 %v3110_v4  ;;  %v3198_v4 = vld [vmem:[#allocation6 + $0x7a8] ss:$16 sps:$4 sm:$0xff]  }
  0xd7   :  { %1829 = vmatpush2.bf16.msra.mxu0 %v3105_v5  ;;  %v3203_v5 = vld [vmem:[#allocation6 + $0x58c] ss:$16 sps:$4 sm:$0xff]  }
  0xd8   :  { %1870 = vmatpush2.bf16.msra.mxu1 %v3108_v6  ;;  %1830 = vmatprep.subr.bf16.mxu0 %v3113_v7  ;;  %v3206_v6 = vld [vmem:[#allocation6 + $0x78c] ss:$16 sps:$4 sm:$0xff]   ;;  %v3201_v7 = vld [vmem:[#allocation6 + $0x588] ss:$16 sps:$4 sm:$0xff]  }
  0xd9   :  { %1871 = vmatprep.subr.bf16.mxu1 %v3116_v8  ;;  %v3204_v8 = vld [vmem:[#allocation6 + $0x788] ss:$16 sps:$4 sm:$0xff]  }
  0xdb   :  { %1831 = vmatpush2.bf16.msra.mxu0 %v3111_v11  ;;  %v3209_v11 = vld [vmem:[#allocation6 + $0x56c] ss:$16 sps:$4 sm:$0xff]  }
  0xdc   :  { %1872 = vmatpush2.bf16.msra.mxu1 %v3114_v12  ;;  %1832 = vmatprep.subr.bf16.mxu0 %v3119_v13  ;;  %v3212_v12 = vld [vmem:[#allocation6 + $0x76c] ss:$16 sps:$4 sm:$0xff]   ;;  %v3207_v13 = vld [vmem:[#allocation6 + $0x568] ss:$16 sps:$4 sm:$0xff]  }
  0xdd   :  { %1873 = vmatprep.subr.bf16.mxu1 %v3122_v14  ;;  %v3210_v14 = vld [vmem:[#allocation6 + $0x768] ss:$16 sps:$4 sm:$0xff]  }
  0xdf   :  { %1833 = vmatpush2.bf16.msra.mxu0 %v3117_v15  ;;  %v3215_v15 = vld [vmem:[#allocation6 + $0x54c] ss:$16 sps:$4 sm:$0xff]  }
  0xe0   :  { %1874 = vmatpush2.bf16.msra.mxu1 %v3120_v16  ;;  %1834 = vmatprep.subr.bf16.mxu0 %v3125_v17  ;;  %v3218_v16 = vld [vmem:[#allocation6 + $0x74c] ss:$16 sps:$4 sm:$0xff]   ;;  %v3213_v17 = vld [vmem:[#allocation6 + $0x548] ss:$16 sps:$4 sm:$0xff]  }
  0xe1   :  { %1875 = vmatprep.subr.bf16.mxu1 %v3128_v18  ;;  %v3216_v18 = vld [vmem:[#allocation6 + $0x748] ss:$16 sps:$4 sm:$0xff]  }
  0xe3   :  { %1835 = vmatpush2.bf16.msra.mxu0 %v3123_v19  ;;  %v3221_v19 = vld [vmem:[#allocation6 + $0x52c] ss:$16 sps:$4 sm:$0xff]  }
  0xe4   :  { %1876 = vmatpush2.bf16.msra.mxu1 %v3126_v20  ;;  %1836 = vmatprep.subr.bf16.mxu0 %v3131_v23  ;;  %v3224_v20 = vld [vmem:[#allocation6 + $0x72c] ss:$16 sps:$4 sm:$0xff]   ;;  %v3219_v23 = vld [vmem:[#allocation6 + $0x528] ss:$16 sps:$4 sm:$0xff]  }
  0xe5   :  { %1877 = vmatprep.subr.bf16.mxu1 %v3134_v24  ;;  %v3222_v24 = vld [vmem:[#allocation6 + $0x728] ss:$16 sps:$4 sm:$0xff]  }
  0xe7   :  { %1837 = vmatpush2.bf16.msra.mxu0 %v3129_v25  ;;  %v3227_v25 = vld [vmem:[#allocation6 + $0x50c] ss:$16 sps:$4 sm:$0xff]  }
  0xe8   :  { %1878 = vmatpush2.bf16.msra.mxu1 %v3132_v26  ;;  %1888 = vmatprep.subr.bf16.mxu0 %v3137_v27  ;;  %v3230_v26 = vld [vmem:[#allocation6 + $0x70c] ss:$16 sps:$4 sm:$0xff]   ;;  %v3225_v27 = vld [vmem:[#allocation6 + $0x508] ss:$16 sps:$4 sm:$0xff]  }
  0xe9   :  { %1929 = vmatprep.subr.bf16.mxu1 %v3140_v28  ;;  %v3228_v28 = vld [vmem:[#allocation6 + $0x708] ss:$16 sps:$4 sm:$0xff]  }
  0xea   :  { %1839 = vmatmul.mubr.bf16.vlgmr.msra.gmra.mxu0 %v3483_v9  ;;  %v3153_v9 = vld [vmem:[#allocation6 + $0x488] ss:$16 sps:$4 sm:$0xff]  }
  0xeb   :  { %1880 = vmatmul.mubr.bf16.vlgmr.msra.gmra.mxu1 %v3485_v10  ;;  %1889 = vmatpush1.bf16.msra.mxu0 %v3135_v29  ;;  %v3156_v10 = vld [vmem:[#allocation6 + $0x688] ss:$16 sps:$4 sm:$0xff]   ;;  %v3233_v29 = vld [vmem:[#allocation8 + $0x74] ss:$8 sps:$4 sm:$0xff]  }
  0xec   :  { %1930 = vmatpush1.bf16.msra.mxu1 %v3138_v30  ;;  %1890 = vmatprep.subr.bf16.mxu0 %v3143_v31  ;;  %v3231_v30 = vld [vmem:[#allocation8 + $0x70] ss:$8 sps:$4 sm:$0xff]   ;;  %v3236_v31 = vld [vmem:[#allocation8 + $0x64] ss:$8 sps:$4 sm:$0xff]  }
  0xed   :  { %1931 = vmatprep.subr.bf16.mxu1 %v3146_v32  ;;  %1920 = vmatprep.mubr.bf16.mxu0 %v3489_v38  ;;  %v3162_v38 = vld [vmem:[#allocation6 + $0x668] ss:$16 sps:$4 sm:$0xff]  }
  0xee   :  { %1961 = vmatprep.mubr.bf16.mxu1 %v3491_v41  ;;  %v3167_v41 = vld [vmem:[#allocation6 + $0x44c] ss:$16 sps:$4 sm:$0xff]  }
  0xef   :  { %1891 = vmatpush1.bf16.msra.mxu0 %v3141_v33 }
  0xf0   :  { %1932 = vmatpush1.bf16.msra.mxu1 %v3144_v34  ;;  %1892 = vmatprep.subr.bf16.mxu0 %v3149_v35  ;;  %v3234_v34 = vld [vmem:[#allocation8 + $0x60] ss:$8 sps:$4 sm:$0xff]  }
  0xf1   :  { %1933 = vmatprep.subr.bf16.mxu1 %v3152_v36 }
  0xf3   :  { %1893 = vmatpush1.bf16.msra.mxu0 %v3147_v37  ;;  %v3239_v37 = vld [vmem:[#allocation8 + $0x54] ss:$8 sps:$4 sm:$0xff]  }
  0xf4   :  { %1934 = vmatpush1.bf16.msra.mxu1 %v3150_v39  ;;  %1894 = vmatprep.subr.bf16.mxu0 %v3155_v40 }
  0xf5   :  { %1935 = vmatprep.subr.bf16.mxu1 %v3158_v50  ;;  %v3237_v50 = vld [vmem:[#allocation8 + $0x50] ss:$8 sps:$4 sm:$0xff]  }
  0xf7   :  { %1895 = vmatpush1.bf16.msra.mxu0 %v3153_v9 }
  0xf8   :  { %1936 = vmatpush1.bf16.msra.mxu1 %v3156_v10  ;;  %1896 = vmatprep.subr.bf16.mxu0 %v3161_v53  ;;  %v3242_v53 = vld [vmem:[#allocation8 + $0x44] ss:$8 sps:$4 sm:$0xff]  }
  0xf9   :  { %1937 = vmatprep.subr.bf16.mxu1 %v3164_v42  ;;  %v3279_v42 = vld [vmem:[#allocation8 + $0x170] ss:$8 sps:$4 sm:$0xff]  }
  0xfb   :  { %1897 = vmatpush1.bf16.msra.mxu0 %v3159_v43  ;;  %v3284_v43 = vld [vmem:[#allocation8 + $0x164] ss:$8 sps:$4 sm:$0xff]  }
  0xfc   :  { %1938 = vmatpush1.bf16.msra.mxu1 %v3162_v38  ;;  %1898 = vmatprep.subr.bf16.mxu0 %v3167_v41  ;;  %v3282_v38 = vld [vmem:[#allocation8 + $0x160] ss:$8 sps:$4 sm:$0xff]   ;;  %v3245_v41 = vld [vmem:[#allocation8 + $0x34] ss:$8 sps:$4 sm:$0xff]  }
  0xfd   :  { %1939 = vmatprep.subr.bf16.mxu1 %v3170_v44  ;;  %v3287_v44 = vld [vmem:[#allocation8 + $0x154] ss:$8 sps:$4 sm:$0xff]  }
  0xff   :  { %1899 = vmatpush1.bf16.msra.mxu0 %v3165_v45  ;;  %v3243_v45 = vld [vmem:[#allocation8 + $0x30] ss:$8 sps:$4 sm:$0xff]  }
 0x100   :  { %1940 = vmatpush1.bf16.msra.mxu1 %v3168_v46  ;;  %1900 = vmatprep.subr.bf16.mxu0 %v3173_v47  ;;  %v3285_v46 = vld [vmem:[#allocation8 + $0x150] ss:$8 sps:$4 sm:$0xff]   ;;  %v3248_v47 = vld [vmem:[#allocation8 + $0x24] ss:$8 sps:$4 sm:$0xff]  }
 0x101   :  { %1941 = vmatprep.subr.bf16.mxu1 %v3176_v48  ;;  %v3290_v48 = vld [vmem:[#allocation8 + $0x144] ss:$8 sps:$4 sm:$0xff]  }
 0x103   :  { %1901 = vmatpush1.bf16.msra.mxu0 %v3171_v49  ;;  %v3246_v49 = vld [vmem:[#allocation8 + $0x20] ss:$8 sps:$4 sm:$0xff]  }
 0x104   :  { %1942 = vmatpush1.bf16.msra.mxu1 %v3174_v51  ;;  %1902 = vmatprep.subr.bf16.mxu0 %v3179_v52  ;;  %v3288_v51 = vld [vmem:[#allocation8 + $0x140] ss:$8 sps:$4 sm:$0xff]   ;;  %v3251_v52 = vld [vmem:[#allocation8 + $0x14] ss:$8 sps:$4 sm:$0xff]  }
 0x105   :  { %1943 = vmatprep.subr.bf16.mxu1 %v3182_v54  ;;  %v3293_v54 = vld [vmem:[#allocation8 + $0x134] ss:$8 sps:$4 sm:$0xff]  }
 0x107   :  { %1903 = vmatpush1.bf16.msra.mxu0 %v3177_v55  ;;  %v3249_v55 = vld [vmem:[#allocation8 + $0x10] ss:$8 sps:$4 sm:$0xff]  }
 0x108   :  { %1944 = vmatpush1.bf16.msra.mxu1 %v3180_v56  ;;  %1904 = vmatprep.subr.bf16.mxu0 %v3185_v57  ;;  %v3291_v56 = vld [vmem:[#allocation8 + $0x130] ss:$8 sps:$4 sm:$0xff]   ;;  %v3254_v57 = vld [vmem:[#allocation8 + $0x4] ss:$8 sps:$4 sm:$0xff]  }
 0x109   :  { %1945 = vmatprep.subr.bf16.mxu1 %v3188_v58  ;;  %v3296_v58 = vld [vmem:[#allocation8 + $0x124] ss:$8 sps:$4 sm:$0xff]  }
 0x10b   :  { %1905 = vmatpush2.bf16.msra.mxu0 %v3183_v59  ;;  %v3252_v59 = vld [vmem:[#allocation8] ss:$8 sps:$4 sm:$0xff]  }
 0x10c   :  { %1946 = vmatpush2.bf16.msra.mxu1 %v3186_v60  ;;  %1906 = vmatprep.subr.bf16.mxu0 %v3191_v61  ;;  %v3294_v60 = vld [vmem:[#allocation8 + $0x120] ss:$8 sps:$4 sm:$0xff]   ;;  %v3257_v61 = vld [vmem:[#allocation8 + $0xf4] ss:$8 sps:$4 sm:$0xff]  }
 0x10d   :  { %1947 = vmatprep.subr.bf16.mxu1 %v3194_v62  ;;  %v3299_v62 = vld [vmem:[#allocation8 + $0x114] ss:$8 sps:$4 sm:$0xff]  }
 0x10f   :  { %1907 = vmatpush2.bf16.msra.mxu0 %v3189_v63  ;;  %v3255_v63 = vld [vmem:[#allocation8 + $0xf0] ss:$8 sps:$4 sm:$0xff]  }
 0x110   :  { %1948 = vmatpush2.bf16.msra.mxu1 %v3192_v0  ;;  %1908 = vmatprep.subr.bf16.mxu0 %v3197_v1  ;;  %v3297_v0 = vld [vmem:[#allocation8 + $0x110] ss:$8 sps:$4 sm:$0xff]   ;;  %v3260_v1 = vld [vmem:[#allocation8 + $0xe4] ss:$8 sps:$4 sm:$0xff]  }
 0x111   :  { %1949 = vmatprep.subr.bf16.mxu1 %v3200_v2  ;;  %v3302_v2 = vld [vmem:[#allocation8 + $0x104] ss:$8 sps:$4 sm:$0xff]  }
 0x113   :  { %1909 = vmatpush2.bf16.msra.mxu0 %v3195_v3  ;;  %v3258_v3 = vld [vmem:[#allocation8 + $0xe0] ss:$8 sps:$4 sm:$0xff]  }
 0x114   :  { %1950 = vmatpush2.bf16.msra.mxu1 %v3198_v4  ;;  %1910 = vmatprep.subr.bf16.mxu0 %v3203_v5  ;;  %v3300_v4 = vld [vmem:[#allocation8 + $0x100] ss:$8 sps:$4 sm:$0xff]   ;;  %v3263_v5 = vld [vmem:[#allocation8 + $0xd4] ss:$8 sps:$4 sm:$0xff]  }
 0x115   :  { %1951 = vmatprep.subr.bf16.mxu1 %v3206_v6  ;;  %v3305_v6 = vld [vmem:[#allocation8 + $0x1f4] ss:$8 sps:$4 sm:$0xff]  }
 0x117   :  { %1911 = vmatpush2.bf16.msra.mxu0 %v3201_v7  ;;  %v3261_v7 = vld [vmem:[#allocation8 + $0xd0] ss:$8 sps:$4 sm:$0xff]  }
 0x118   :  { %1952 = vmatpush2.bf16.msra.mxu1 %v3204_v8  ;;  %1912 = vmatprep.subr.bf16.mxu0 %v3209_v11  ;;  %v3303_v8 = vld [vmem:[#allocation8 + $0x1f0] ss:$8 sps:$4 sm:$0xff]   ;;  %v3266_v11 = vld [vmem:[#allocation8 + $0xc4] ss:$8 sps:$4 sm:$0xff]  }
 0x119   :  { %1953 = vmatprep.subr.bf16.mxu1 %v3212_v12  ;;  %v3308_v12 = vld [vmem:[#allocation8 + $0x1e4] ss:$8 sps:$4 sm:$0xff]  }
 0x11b   :  { %1913 = vmatpush2.bf16.msra.mxu0 %v3207_v13  ;;  %v3264_v13 = vld [vmem:[#allocation8 + $0xc0] ss:$8 sps:$4 sm:$0xff]  }
 0x11c   :  { %1954 = vmatpush2.bf16.msra.mxu1 %v3210_v14  ;;  %1914 = vmatprep.subr.bf16.mxu0 %v3215_v15  ;;  %v3306_v14 = vld [vmem:[#allocation8 + $0x1e0] ss:$8 sps:$4 sm:$0xff]   ;;  %v3269_v15 = vld [vmem:[#allocation8 + $0xb4] ss:$8 sps:$4 sm:$0xff]  }
 0x11d   :  { %1955 = vmatprep.subr.bf16.mxu1 %v3218_v16  ;;  %v3311_v16 = vld [vmem:[#allocation8 + $0x1d4] ss:$8 sps:$4 sm:$0xff]  }
 0x11f   :  { %1915 = vmatpush2.bf16.msra.mxu0 %v3213_v17  ;;  %v342_v17 = vlaneseq }
 0x120   :  { %1956 = vmatpush2.bf16.msra.mxu1 %v3216_v18  ;;  %1916 = vmatprep.subr.bf16.mxu0 %v3221_v19  ;;  %v3267_v18 = vld [vmem:[#allocation8 + $0xb0] ss:$8 sps:$4 sm:$0xff]  }
 0x121   :  { %1957 = vmatprep.subr.bf16.mxu1 %v3224_v20  ;;  %v3309_v19 = vld [vmem:[#allocation8 + $0x1d0] ss:$8 sps:$4 sm:$0xff]   ;;  %v3272_v20 = vld [vmem:[#allocation8 + $0xa4] ss:$8 sps:$4 sm:$0xff]  }
 0x123   :  { %1917 = vmatpush2.bf16.msra.mxu0 %v3219_v23  ;;  %v3314_v23 = vld [vmem:[#allocation8 + $0x1c4] ss:$8 sps:$4 sm:$0xff]  }
 0x124   :  { %1958 = vmatpush2.bf16.msra.mxu1 %v3222_v24  ;;  %1918 = vmatprep.subr.bf16.mxu0 %v3227_v25  ;;  %v3518_v24 = vshrl.u32 %v342_v17, 7  ;;  %v3270_v25 = vld [vmem:[#allocation8 + $0xa0] ss:$8 sps:$4 sm:$0xff]  }
 0x125   :  { %1959 = vmatprep.subr.bf16.mxu1 %v3230_v26  ;;  %v3312_v26 = vld [vmem:[#allocation8 + $0x1c0] ss:$8 sps:$4 sm:$0xff]  }
 0x127   :  { %1919 = vmatpush2.bf16.msra.mxu0 %v3225_v27  ;;  %v3275_v27 = vld [vmem:[#allocation8 + $0x94] ss:$8 sps:$4 sm:$0xff]  }
 0x128   :  { %1960 = vmatpush2.bf16.msra.mxu1 %v3228_v28  ;;  %2378 = vmatprep.subr.bf16.mxu0 %v3233_v29  ;;  %v3317_v28 = vld [vmem:[#allocation8 + $0x1b4] ss:$8 sps:$4 sm:$0xff]   ;;  %v3521_v29 = vsub.s32 0, %v3518_v24 }
 0x12a   :  { %v3507_v32 = vpop.f32.mrf.mxu0  ;;  %1921 = vmatmul.mubr.bf16.vlgmr.msra.gmra.mxu0 %v3495_v21  ;;  %v3281_v21 = vld [vmem:[#allocation8 + $0x174] ss:$8 sps:$4 sm:$0xff]  }
 0x12b   :  { %v3509_v33 = vpop.f32.mrf.mxu1  ;;  %1962 = vmatmul.mubr.bf16.vlgmr.msra.gmra.mxu1 %v3497_v22  ;;  %2379 = vmatpush1.bf16.msra.mxu0 %v3231_v30  ;;  %v3240_v22 = vld [vmem:[#allocation8 + $0x40] ss:$8 sps:$4 sm:$0xff]  }
 0x12c   :  { %v3513_v35 = vpop.f32.mrf.mxu0  ;;  %2380 = vmatprep.subr.bf16.mxu0 %v3236_v31  ;;  %2419 = vmatprep.subr.bf16.mxu1 %v3281_v21  ;;  %v3526_v30 = vld [vmem:[%s3560_s2] sm:$0xf]  ;;  %v3529_v31 = vsub.s32 1, %v3518_v24 }
 0x12d   :  { %v3515_v36 = vpop.f32.mrf.mxu1  ;;  %2420 = vmatpush1.bf16.msra.mxu1 %v3279_v42 }
 0x12e   :  { %v1680_v39 = vpop.f32.mrf.mxu0  ;;  %2421 = vmatprep.subr.bf16.mxu1 %v3284_v43 }
 0x12f   :  { %v1721_v40 = vpop.f32.mrf.mxu1  ;;  %2381 = vmatpush1.bf16.msra.mxu0 %v3234_v34  ;;  %v3273_v34 = vld [vmem:[#allocation8 + $0x90] ss:$8 sps:$4 sm:$0xff]   ;;  %v3278_v39 = vld [vmem:[#allocation8 + $0x84] ss:$8 sps:$4 sm:$0xff]  }
 0x130   :  { %v1681_v9 = vpop.f32.mrf.mxu0  ;;  %2382 = vmatprep.subr.bf16.mxu0 %v3239_v37  ;;  %v3315_v37 = vld [vmem:[#allocation8 + $0x1b0] ss:$8 sps:$4 sm:$0xff]   ;;  %v345_v40 = vrot.slane %v3526_v30, %v3521_v29 }
 0x131   :  { %v1722_v10 = vpop.f32.mrf.mxu1  ;;  %2422 = vmatpush1.bf16.msra.mxu1 %v3282_v38  ;;  %v3276_v9 = vld [vmem:[#allocation8 + $0x80] ss:$8 sps:$4 sm:$0xff]  }
 0x132   :  { %2423 = vmatprep.subr.bf16.mxu1 %v3287_v44  ;;  %v1677_v10 = vadd.f32 %v3507_v32, %v345_v40  ;;  %v3318_v44 = vld [vmem:[#allocation8 + $0x1a0] ss:$8 sps:$4 sm:$0xff]  }
 0x133   :  { %2383 = vmatpush1.bf16.msra.mxu0 %v3237_v50  ;;  %v349_v50 = vrot.slane %v3526_v30, %v3529_v31 }
 0x134   :  { %2384 = vmatprep.subr.bf16.mxu0 %v3242_v53  ;;  %v1718_v42 = vadd.f32 %v3509_v33, %v1677_v10 }
 0x135   :  { %2424 = vmatpush1.bf16.msra.mxu1 %v3285_v46  ;;  %v1679_v53 = vadd.f32 %v3513_v35, %v349_v50 }
 0x136   :  { %2425 = vmatprep.subr.bf16.mxu1 %v3290_v48 }
 0x137   :  { %2385 = vmatpush1.bf16.msra.mxu0 %v3240_v22  ;;  %v3320_v22 = vld [vmem:[#allocation8 + $0x1a4] ss:$8 sps:$4 sm:$0xff]   ;;  %v1720_v38 = vadd.f32 %v3515_v36, %v1679_v53 }
 0x138   :  { %2386 = vmatprep.subr.bf16.mxu0 %v3245_v41 }
 0x139   :  { %2426 = vmatpush1.bf16.msra.mxu1 %v3288_v51  ;;  %v3323_v51 = vld [vmem:[#allocation8 + $0x194] ss:$8 sps:$4 sm:$0xff]  }
 0x13a   :  { %2427 = vmatprep.subr.bf16.mxu1 %v3293_v54  ;;  %v3321_v54 = vld [vmem:[#allocation8 + $0x190] ss:$8 sps:$4 sm:$0xff]  }
 0x13b   :  { %2387 = vmatpush1.bf16.msra.mxu0 %v3243_v45 }
 0x13c   :  { %2388 = vmatprep.subr.bf16.mxu0 %v3248_v47 }
 0x13d   :  { %2428 = vmatpush1.bf16.msra.mxu1 %v3291_v56 }
 0x13e   :  { %2429 = vmatprep.subr.bf16.mxu1 %v3296_v58 }
 0x13f   :  { %2389 = vmatpush1.bf16.msra.mxu0 %v3246_v49 }
 0x140   :  { %2390 = vmatprep.subr.bf16.mxu0 %v3251_v52 }
 0x141   :  { %2430 = vmatpush1.bf16.msra.mxu1 %v3294_v60 }
 0x142   :  { %2431 = vmatprep.subr.bf16.mxu1 %v3299_v62 }
 0x143   :  { %2391 = vmatpush1.bf16.msra.mxu0 %v3249_v55 }
 0x144   :  { %2392 = vmatprep.subr.bf16.mxu0 %v3254_v57  ;;  %v3326_v57 = vld [vmem:[#allocation8 + $0x184] ss:$8 sps:$4 sm:$0xff]  }
 0x145   :  { %2432 = vmatpush1.bf16.msra.mxu1 %v3297_v0 }
 0x146   :  { %2433 = vmatprep.subr.bf16.mxu1 %v3302_v2 }
 0x147   :  { %2393 = vmatpush1.bf16.msra.mxu0 %v3252_v59  ;;  %v3324_v59 = vld [vmem:[#allocation8 + $0x180] ss:$8 sps:$4 sm:$0xff]  }
 0x148   :  { %2394 = vmatprep.subr.bf16.mxu0 %v3257_v61 }
 0x149   :  { %2434 = vmatpush1.bf16.msra.mxu1 %v3300_v4 }
 0x14a   :  { %2435 = vmatprep.subr.bf16.mxu1 %v3305_v6  ;;  %v352_v6 = vsub.s32 2, %v3518_v24 }
 0x14b   :  { %2395 = vmatpush2.bf16.msra.mxu0 %v3255_v63 }
 0x14c   :  { %2396 = vmatprep.subr.bf16.mxu0 %v3260_v1 }
 0x14d   :  { %2436 = vmatpush2.bf16.msra.mxu1 %v3303_v8  ;;  %v353_v8 = vrot.slane %v3526_v30, %v352_v6 }
 0x14e   :  { %2437 = vmatprep.subr.bf16.mxu1 %v3308_v12 }
 0x14f   :  { %2397 = vmatpush2.bf16.msra.mxu0 %v3258_v3 }
 0x150   :  { %2398 = vmatprep.subr.bf16.mxu0 %v3263_v5 }
 0x151   :  { %2438 = vmatpush2.bf16.msra.mxu1 %v3306_v14 }
 0x152   :  { %2439 = vmatprep.subr.bf16.mxu1 %v3311_v16 }
 0x153   :  { %2399 = vmatpush2.bf16.msra.mxu0 %v3261_v7  ;;  %v356_v7 = vsub.s32 3, %v3518_v24 }
 0x154   :  { %2400 = vmatprep.subr.bf16.mxu0 %v3266_v11 }
 0x155   :  { %2440 = vmatpush2.bf16.msra.mxu1 %v3309_v19  ;;  %v357_v11 = vrot.slane %v3526_v30, %v356_v7 }
 0x156   :  { %2441 = vmatprep.subr.bf16.mxu1 %v3314_v23 }
 0x157   :  { %2401 = vmatpush2.bf16.msra.mxu0 %v3264_v13 }
 0x158   :  { %2402 = vmatprep.subr.bf16.mxu0 %v3269_v15 }
 0x159   :  { %2442 = vmatpush2.bf16.msra.mxu1 %v3312_v26 }
 0x15a   :  { %2443 = vmatprep.subr.bf16.mxu1 %v3317_v28 }
 0x15b   :  { %2403 = vmatpush2.bf16.msra.mxu0 %v3267_v18 }
 0x15c   :  { %2404 = vmatprep.subr.bf16.mxu0 %v3272_v20 }
 0x15d   :  { %2444 = vmatpush2.bf16.msra.mxu1 %v3315_v37 }
 0x15e   :  { %2445 = vmatprep.subr.bf16.mxu1 %v3320_v22 }
 0x15f   :  { %2405 = vmatpush2.bf16.msra.mxu0 %v3270_v25 }
 0x160   :  { %2406 = vmatprep.subr.bf16.mxu0 %v3275_v27 }
 0x161   :  { %2446 = vmatpush2.bf16.msra.mxu1 %v3318_v44 }
 0x162   :  { %2447 = vmatprep.subr.bf16.mxu1 %v3323_v51  ;;  %v2464_v51 = vld [vmem:[%s3563_s5] sm:$0x3]  ;;  %s3424_s5 = smov [#allocation9]  }
 0x163   :  { %2407 = vmatpush2.bf16.msra.mxu0 %v3273_v34  ;;  %s2507_s23 = sshll.u32 %s3424_s5, 4  ;;  %s2508_s23 = int_to_ptr.vmem [resolvable:$true] %s2507_s23 }
 0x164   :  { %2408 = vmatprep.subr.bf16.mxu0 %v3278_v39  ;;  %s3391_s24 = scalar_lea.vmem %s2508_s23, 16  ;;  %s3395_s25 = scalar_lea.vmem %s2508_s23, 32 }
 0x165   :  { %2448 = vmatpush2.bf16.msra.mxu1 %v3321_v54  ;;  %p3392_p1 = scmp.ne.s32.totalorder %s2508_s23, %s3391_s24  ;;  %p3396_p2 = scmp.lt.s32.totalorder %s2508_s23, %s2508_s23 }
 0x166   :  { %2449 = vmatprep.subr.bf16.mxu1 %v3326_v57  ;;  %p3397_p3 = scmp.lt.s32.totalorder %s3395_s25, %s3391_s24 }
 0x167   :  { %2409 = vmatpush2.bf16.msra.mxu0 %v3276_v9 }
 0x168   :  { %p3398_p4 = por %p3397_p3, %p3396_p2 }
 0x169   :  { %2450 = vmatpush2.bf16.msra.mxu1 %v3324_v59 }
 0x16a   :  { %v1758_v21 = vpop.f32.mrf.mxu0  ;;  %p3399_p5 = pnand %p3398_p4, %p3392_p1 }
 0x16b   :  { %v1799_v43 = vpop.f32.mrf.mxu1  ;;  %v1759_v41 = vadd.f32 %v1758_v21, %v1718_v42 }
 0x16c   :  { %v1760_v45 = vpop.f32.mrf.mxu0 }
 0x16d   :  { %v1801_v46 = vpop.f32.mrf.mxu1  ;;  %v1800_v47 = vadd.f32 %v1799_v43, %v1759_v41  ;;  %v1761_v48 = vadd.f32 %v1760_v45, %v1720_v38  ;;  %v2481_v38 = vld [vmem:[#allocation2] sm:$0x1] }
 0x16e   :  { %v1762_v49 = vpop.f32.mrf.mxu0  ;;  %2837 = vpush %v2481_v38  ;;  %v2046_v41 = vld [vmem:[%s3562_s4] sm:$0x3] }
 0x16f   :  { %v1803_v32 = vpop.f32.mrf.mxu1  ;;  %v1970_v35 = vmul.f32 0.2, %v1800_v47  ;;  %v1802_v52 = vadd.f32 %v1801_v46, %v1761_v48  ;;  %v2051_v44 = vrot.slane %v2046_v41, %v3521_v29  ;;  %v2055_v45 = vrot.slane %v2046_v41, %v3529_v31 }
 0x170   :  { %v1763_v33 = vpop.f32.mrf.mxu0 }
 0x171   :  { %v1804_v55 = vpop.f32.mrf.mxu1  ;;  %v1971_v56 = vmul.f32 0.2, %v1802_v52  ;;  %v1974_v36 = vmax.f32 %v1800_v47, %v1970_v35 }
 0x173   :  { %v1975_v58 = vmax.f32 %v1802_v52, %v1971_v56  ;;  %v1978_v61 = vpack.c.bf16 %v1974_v36, %v1974_v36  ;;  %v2469_v56 = vrot.slane %v2464_v51, %v3521_v29  ;;  %v2473_v36 = vrot.slane %v2464_v51, %v3529_v31 }
 0x174   :  { %v2493_v29 = vand.u32 127, %v342_v17 }
 0x175   :  { %v1979_v60 = vpack.c.bf16 %v1975_v58, %v1975_v58 }
 0x176   :  { %v2496_v31 = vsub.s32 %v2493_v29, %v3518_v24 }
 0x177   :  { %2410 = vmatprep.mubr.bf16.mxu0 %v1979_v60 }
 0x178   :  { %2411 = vmatmul.mubr.bf16.vlgmr.msra.gmra.mxu0 %v1978_v61 }
 0x19f   :  { %s2838_s4 = spop %2837 }
 0x1aa   :  { %v1840_v62 = vpop.f32.mrf.mxu0 }
 0x1ab   :  { %v1881_v63 = vpop.f32.mrf.mxu1  ;;  %v1841_v12 = vadd.f32 %v1840_v62, %v353_v8  ;;  %v2483_v62 = vstv %s2838_s4 }
 0x1ac   :  { %v1842_v0 = vpop.f32.mrf.mxu0 }
 0x1ad   :  { %v1883_v1 = vpop.f32.mrf.mxu1  ;;  %v1843_v13 = vadd.f32 %v1842_v0, %v357_v11  ;;  %v1882_v14 = vadd.f32 %v1881_v63, %v1841_v12 }
 0x1ae   :  { %v1844_v2 = vpop.f32.mrf.mxu0 }
 0x1af   :  { %v1885_v3 = vpop.f32.mrf.mxu1  ;;  %v1884_v18 = vadd.f32 %v1883_v1, %v1843_v13 }
 0x1b0   :  { %v1845_v4 = vpop.f32.mrf.mxu0 }
 0x1b1   :  { %v1886_v5 = vpop.f32.mrf.mxu1 }
 0x1ea   :  { %v1922_v15 = vpop.f32.mrf.mxu0 }
 0x1eb   :  { %v1963_v16 = vpop.f32.mrf.mxu1  ;;  %v1923_v19 = vadd.f32 %v1922_v15, %v1882_v14 }
 0x1ec   :  { %v1924_v20 = vpop.f32.mrf.mxu0 }
 0x1ed   :  { %v1965_v23 = vpop.f32.mrf.mxu1  ;;  %v1964_v25 = vadd.f32 %v1963_v16, %v1923_v19  ;;  %v1925_v26 = vadd.f32 %v1924_v20, %v1884_v18 }
 0x1ee   :  { %v1926_v27 = vpop.f32.mrf.mxu0 }
 0x1ef   :  { %v1967_v28 = vpop.f32.mrf.mxu1  ;;  %v1972_v34 = vmul.f32 0.2, %v1964_v25  ;;  %v1966_v37 = vadd.f32 %v1965_v23, %v1925_v26 }
 0x1f0   :  { %v1927_v39 = vpop.f32.mrf.mxu0 }
 0x1f1   :  { %v1968_v40 = vpop.f32.mrf.mxu1  ;;  %v1973_v50 = vmul.f32 0.2, %v1966_v37  ;;  %v1976_v9 = vmax.f32 %v1964_v25, %v1972_v34 }
 0x1f3   :  { %v1977_v30 = vmax.f32 %v1966_v37, %v1973_v50  ;;  %v1980_v53 = vpack.c.bf16 %v1976_v9, %v1976_v9 }
 0x1f5   :  { %v1981_v10 = vpack.c.bf16 %v1977_v30, %v1977_v30 }
 0x1f7   :  { %2451 = vmatprep.mubr.bf16.mxu1 %v1981_v10 }
 0x1f8   :  { %2452 = vmatmul.mubr.bf16.vlgmr.msra.gmra.mxu1 %v1980_v53 }
 0x238   :  { %v2412_v42 = vpop.f32.mrf.mxu0 }
 0x239   :  { %v2413_v46 = vadd.f32 %v2412_v42, %v2051_v44 }
 0x23a   :  { %v2414_v21 = vpop.f32.mrf.mxu0 }
 0x23b   :  { %v2415_v48 = vadd.f32 %v2414_v21, %v2055_v45 }
 0x23c   :  { %v2416_v43 = vpop.f32.mrf.mxu0 }
 0x23e   :  { %v2417_v22 = vpop.f32.mrf.mxu0 }
 0x2b8   :  { %v2453_v47 = vpop.f32.mrf.mxu1 }
 0x2b9   :  { %v2454_v49 = vadd.f32 %v2453_v47, %v2413_v46 }
 0x2ba   :  { %v2455_v32 = vpop.f32.mrf.mxu1 }
 0x2bb   :  { %v2460_v35 = vmul.f32 0.2, %v2454_v49  ;;  %v2456_v52 = vadd.f32 %v2455_v32, %v2415_v48 }
 0x2bc   :  { %v2457_v54 = vpop.f32.mrf.mxu1 }
 0x2bd   :  { %v2462_v33 = vmax.f32 %v2454_v49, %v2460_v35  ;;  %v2461_v55 = vmul.f32 0.2, %v2456_v52 }
 0x2be   :  { %v2458_v57 = vpop.f32.mrf.mxu1 }
 0x2bf   :  { %v2463_v58 = vmax.f32 %v2456_v52, %v2461_v55  ;;  %v2476_v59 = vmul.f32 %v2469_v56, %v2462_v33 }
 0x2c1   :  { %v2477_v60 = vmul.f32 %v2473_v36, %v2463_v58 }
 0x2c3   :  { %v2478_v61 = vadd.f32 %v2477_v60, %v2476_v59 }
 0x2c5   :  { %2479 = vadd.xlane.f32.xlu0 %v2478_v61 }
 0x34e   :  { %v2480_v63 = vpop.xlane.xlu0 %2479 }
 0x34f   :  { %v2484_v0 = vadd.f32 %v2483_v62, %v2480_v63 }
 0x351   :  { %v2485_v1 = vsub.f32 0.0, %v2484_v0 }
 0x353   :  { %v2486_v2 = vmul.f32 1.442695, %v2485_v1 }
 0x355   :  { %3327 = vpow2.f32 %v2486_v2 }
 0x362   :  { %v3328_v3 = vpop.eup %3327 }
 0x363   :  { %v2488_v4 = vadd.f32 1.0, %v3328_v3 }
 0x365   :  { %3329 = vrcp.f32 %v2488_v4 }
 0x372   :  { %v3330_v5 = vpop.eup %3329 }
 0x373   :  { %v2497_v6 = vrot.slane %v3330_v5, %v2496_v31 }
 0x375   :  { %2500 = vst.msk [vmem:[#allocation9] sm:$0x1] %vm2499_vm0, %v2497_v6 }
 0x376   :  { %3402 = shalt.err (!%p3399_p5)
}
 0x377   :  { %2510 = dma.vmem_to_hbm [thread:$0]  %s2508_s23, 16, %s3565_s7, [#allocation5]  }
 0x378   :  { %3415 = dma.done.wait [#allocation5], 16  }
 0x379   :  { %3416 = vsyncadd [#allocation5], 4294967280 }
 0x37a   :  { %2514 = vsyncpa [#allocation4], 1 }
 0x37b   :  { %2515 = vsyncpa [#allocation7], 1 }
 0x37c   :  { %2516 = vsyncpa [#allocation5], 1 }

</bundles_post_ra>
